<compile_context>
chip_gen: v6e
topology: v6e:2x2x1
jax: 0.10.0
libtpu: 0.0.40
codegen_flags: <defaults>
</compile_context>

<pallas_src>
import functools

import numpy as np
import jax
import jax.numpy as jnp
from jax.experimental import pallas as pl
from jax.experimental.pallas import tpu as pltpu

BF16 = jnp.bfloat16
F32 = jnp.float32


def _whole(shape):
    """BlockSpec for an untiled (fully resident) operand."""
    zeros = (0,) * len(shape)
    return pl.BlockSpec(shape, lambda *_: zeros)


# ----------------------------------------------------------------------------
# Kernel P: K / V projections (per head), column-major (dim, tile) blocks.
# ----------------------------------------------------------------------------
def _kv_proj_kernel(x_ref, wk_ref, bk_ref, wv_ref, bv_ref, k_ref, v_ref, *,
                    num_heads):
    xb = x_ref[0].astype(BF16)                                   # (D, tile)
    for h in range(num_heads):
        kh = jnp.dot(wk_ref[h], xb, preferred_element_type=F32) + bk_ref[h]
        vh = jnp.dot(wv_ref[h], xb, preferred_element_type=F32) + bv_ref[h]
        k_ref[0, h] = kh.astype(BF16)                            # (dim, tile)
        v_ref[0, h] = vh.astype(BF16)


# ----------------------------------------------------------------------------
# Kernel A: Q proj + attention + merge + MLP1 + BatchNorm partial sums.
# ----------------------------------------------------------------------------
def _attn_mlp1_kernel(x_ref, k_ref, v_ref, wq_ref, bq_ref, wm_ref, bm_ref,
                      w1x_ref, w1m_ref, b1_ref, z1_ref, st_ref, *, num_heads):
    xb = x_ref[0].astype(BF16)                                   # (D, tile)

    head_outs = []
    for h in range(num_heads):
        # Q projection for this query tile (scale 1/sqrt(dim) folded in).
        qh = jnp.dot(wq_ref[h], xb, preferred_element_type=F32) + bq_ref[h]
        qr = jnp.transpose(qh).astype(BF16)                      # (tile, dim)
        # Scores against the full key sequence of this batch element.
        s = jnp.dot(qr, k_ref[0, h], preferred_element_type=F32)  # (tile, N)
        s = s - jnp.max(s, axis=-1, keepdims=True)
        p = jnp.exp(s)
        denom = jnp.sum(p, axis=-1, keepdims=True)
        p = p * pl.reciprocal(denom, approx=True)
        # PV, kept column-major: (dim, tile) = V (dim, N) @ P^T (N, tile).
        oh = jnp.einsum('dk,qk->dq', v_ref[0, h], p.astype(BF16),
                        preferred_element_type=F32)
        head_outs.append(oh)

    # Head concat along channels (sublanes) -> ONE K=D merge matmul.
    att = jnp.concatenate(head_outs, axis=0).astype(BF16)        # (D, tile)
    msg = jnp.dot(wm_ref[...], att, preferred_element_type=F32) + bm_ref[...]

    # MLP layer 1 without materializing cat([x, msg]) (weights row-split).
    z1 = (jnp.dot(w1x_ref[...], xb, preferred_element_type=F32)
          + jnp.dot(w1m_ref[...], msg.astype(BF16), preferred_element_type=F32)
          + b1_ref[...])                                         # (2D, tile)
    z1_ref[0] = z1

    # BatchNorm partial statistics: single pass (sum, sum of squares).
    s1 = jnp.sum(z1, axis=1, keepdims=True)                      # (2D, 1)
    s2 = jnp.sum(z1 * z1, axis=1, keepdims=True)
    st_ref[0, 0] = jnp.concatenate([s1, s2], axis=1)             # (2D, 2)


# ----------------------------------------------------------------------------
# Kernel B: BatchNorm apply + ReLU + MLP2 + residual, output in (B, D, N).
# ----------------------------------------------------------------------------
def _bn_mlp2_kernel(z1_ref, x_ref, scale_ref, shift_ref, w2_ref, b2_ref,
                    out_ref):
    h1 = jnp.maximum(z1_ref[0] * scale_ref[...] + shift_ref[...], 0.0)
    delta = jnp.dot(w2_ref[...], h1.astype(BF16),
                    preferred_element_type=F32)                  # (D, tile)
    out_ref[0] = x_ref[0] + delta + b2_ref[...]


# ----------------------------------------------------------------------------
# One AttentionalPropagation layer = 3 pallas_calls + tiny BN-stats glue.
# ----------------------------------------------------------------------------
def _layer_forward(x, p, *, num_heads, tile, bn_eps):
    B, D, N = x.shape
    H = num_heads
    hd = D // H
    F = 2 * D
    T = N // tile
    grid = (B, T)
    cparams = pltpu.CompilerParams(
        dimension_semantics=("parallel", "parallel"),
        vmem_limit_bytes=48 * 1024 * 1024)

    x_spec = pl.BlockSpec((1, D, tile), lambda b, t: (b, 0, t))

    # --- Kernel P: K / V projections --------------------------------------
    k, v = pl.pallas_call(
        functools.partial(_kv_proj_kernel, num_heads=H),
        grid=grid,
        in_specs=[x_spec,
                  _whole((H, hd, D)), _whole((H, hd, 1)),
                  _whole((H, hd, D)), _whole((H, hd, 1))],
        out_specs=[pl.BlockSpec((1, H, hd, tile), lambda b, t: (b, 0, 0, t)),
                   pl.BlockSpec((1, H, hd, tile), lambda b, t: (b, 0, 0, t))],
        out_shape=[jax.ShapeDtypeStruct((B, H, hd, N), BF16),
                   jax.ShapeDtypeStruct((B, H, hd, N), BF16)],
        compiler_params=cparams,
    )(x, p["wk"], p["bk"], p["wv"], p["bv"])

    # --- Kernel A: attention + merge + MLP1 + BN partials ------------------
    z1, stats = pl.pallas_call(
        functools.partial(_attn_mlp1_kernel, num_heads=H),
        grid=grid,
        in_specs=[x_spec,
                  pl.BlockSpec((1, H, hd, N), lambda b, t: (b, 0, 0, 0)),
                  pl.BlockSpec((1, H, hd, N), lambda b, t: (b, 0, 0, 0)),
                  _whole((H, hd, D)), _whole((H, hd, 1)),
                  _whole((D, D)), _whole((D, 1)),
                  _whole((F, D)), _whole((F, D)), _whole((F, 1))],
        out_specs=[pl.BlockSpec((1, F, tile), lambda b, t: (b, 0, t)),
                   pl.BlockSpec((1, 1, F, 2), lambda b, t: (b, t, 0, 0))],
        out_shape=[jax.ShapeDtypeStruct((B, F, N), F32),
                   jax.ShapeDtypeStruct((B, T, F, 2), F32)],
        compiler_params=cparams,
    )(x, k, v, p["wq"], p["bq"], p["wm"], p["bm"],
      p["w1x"], p["w1m"], p["b1"])

    # --- BN statistics finalize (cross-tile reduction; tiny XLA op) --------
    cnt = float(B * N)
    s = jnp.sum(stats, axis=(0, 1))                              # (F, 2)
    mean = s[:, 0] / cnt
    var = jnp.maximum(s[:, 1] / cnt - mean * mean, 0.0)
    inv = jax.lax.rsqrt(var + bn_eps)
    scale = (p["gamma"] * inv).reshape(F, 1).astype(F32)
    shift = (p["beta"] - mean * p["gamma"] * inv).reshape(F, 1).astype(F32)

    # --- Kernel B: BN apply + ReLU + MLP2 + residual -----------------------
    x_out = pl.pallas_call(
        _bn_mlp2_kernel,
        grid=grid,
        in_specs=[pl.BlockSpec((1, F, tile), lambda b, t: (b, 0, t)),
                  x_spec,
                  _whole((F, 1)), _whole((F, 1)),
                  _whole((D, F)), _whole((D, 1))],
        out_specs=pl.BlockSpec((1, D, tile), lambda b, t: (b, 0, t)),
        out_shape=jax.ShapeDtypeStruct((B, D, N), F32),
        compiler_params=cparams,
    )(z1, x, scale, shift, p["w2"], p["b2"])
    return x_out


def self_attentional_layer_pallas(kline_desc, layers, *, num_heads,
                                  bn_eps=1e-5, tile=None):
    """kline_desc: (B, D, N) Conv1d NCL layout, same as the PyTorch module."""
    B, D, N = kline_desc.shape
    assert D % num_heads == 0
    if tile is None:
        tile = N
        for cand in (512, 256, 128):
            if N % cand == 0:
                tile = cand
                break
    assert N % tile == 0 and (tile % 128 == 0 or tile == N)
    x = kline_desc.astype(F32)
    for p in layers:
        x = _layer_forward(x, p, num_heads=num_heads, tile=tile, bn_eps=bn_eps)
    return x


# ----------------------------------------------------------------------------
# Hoisted weight plumbing (numpy, done once, off the forward path).
# Weights stay in the PyTorch (out_ch, in_ch) orientation; head split just
# reorders output channels (PyTorch channel c = d*heads + h); 1/sqrt(dim) is
# folded into the query projection; matmul weights are stored bf16.
# ----------------------------------------------------------------------------
def prepare_layer(params, num_heads):
    g = lambda n: np.asarray(params[n], np.float32)
    D = g("wq").shape[0]
    H = num_heads
    hd = D // H
    F = 2 * D
    scale = 1.0 / np.sqrt(hd)

    def head_split_w(w):
        out = np.empty((H, hd, D), np.float32)
        for h in range(H):
            out[h] = w[[d * H + h for d in range(hd)], :]
        return out

    def head_split_b(b):
        out = np.empty((H, hd, 1), np.float32)
        for h in range(H):
            out[h, :, 0] = b[[d * H + h for d in range(hd)]]
        return out

    merge_perm = np.array([d * H + h for h in range(H) for d in range(hd)])
    w1 = g("w1")
    return dict(
        wq=jnp.asarray(head_split_w(g("wq")) * scale, BF16),
        bq=jnp.asarray(head_split_b(g("bq")) * scale, F32),
        wk=jnp.asarray(head_split_w(g("wk")), BF16),
        bk=jnp.asarray(head_split_b(g("bk")), F32),
        wv=jnp.asarray(head_split_w(g("wv")), BF16),
        bv=jnp.asarray(head_split_b(g("bv")), F32),
        wm=jnp.asarray(g("wm")[:, merge_perm], BF16),
        bm=jnp.asarray(g("bm").reshape(D, 1), F32),
        w1x=jnp.asarray(w1[:, :D], BF16),
        w1m=jnp.asarray(w1[:, D:], BF16),
        b1=jnp.asarray(g("b1").reshape(F, 1), F32),
        gamma=jnp.asarray(g("gamma"), F32),
        beta=jnp.asarray(g("beta"), F32),
        w2=jnp.asarray(g("w2"), BF16),
        b2=jnp.asarray(g("b2").reshape(D, 1), F32),
    )


# ----------------------------------------------------------------------------
# Deterministic parameter init (mirrors nn.Conv1d / BatchNorm1d defaults).
# ----------------------------------------------------------------------------
def make_layer_params(key, feature_dim):
    D = feature_dim
    keys = jax.random.split(key, 6)

    def conv_init(k, out_c, in_c):
        bound = 1.0 / np.sqrt(in_c)
        kw, kb = jax.random.split(k)
        w = jax.random.uniform(kw, (out_c, in_c), jnp.float32, -bound, bound)
        b = jax.random.uniform(kb, (out_c,), jnp.float32, -bound, bound)
        return w, b

    wq, bq = conv_init(keys[0], D, D)
    wk, bk = conv_init(keys[1], D, D)
    wv, bv = conv_init(keys[2], D, D)
    wm, bm = conv_init(keys[3], D, D)
    w1, b1 = conv_init(keys[4], 2 * D, 2 * D)
    w2, b2 = conv_init(keys[5], D, 2 * D)
    b2 = jnp.zeros_like(b2)                     # nn.init.constant_(mlp[-1].bias, 0)
    return dict(wq=wq, bq=bq, wk=wk, bk=bk, wv=wv, bv=bv, wm=wm, bm=bm,
                w1=w1, b1=b1, gamma=jnp.ones((2 * D,), jnp.float32),
                beta=jnp.zeros((2 * D,), jnp.float32), w2=w2, b2=b2)


# ----------------------------------------------------------------------------
# Pure-JAX f32 reference (direct transcription of the PyTorch math).
# NOTE: BatchNorm uses training-mode biased batch statistics (a freshly
# constructed PyTorch module's forward()), not eval-mode running stats.
# ----------------------------------------------------------------------------
def ref_forward(x_bdn, layer_params, num_heads, bn_eps=1e-5):
    x = x_bdn
    hp = dict(precision="highest")
    for p in layer_params:
        B, D, N = x.shape
        dim = D // num_heads

        def conv1d(w, b, t):
            return jnp.einsum("oi,bin->bon", w, t, **hp) + b[None, :, None]

        q = conv1d(p["wq"], p["bq"], x)
        k = conv1d(p["wk"], p["bk"], x)
        v = conv1d(p["wv"], p["bv"], x)
        q4 = q.reshape(B, dim, num_heads, N)
        k4 = k.reshape(B, dim, num_heads, N)
        v4 = v.reshape(B, dim, num_heads, N)
        scores = jnp.einsum("bdhn,bdhm->bhnm", q4, k4, **hp) / (dim ** 0.5)
        prob = jax.nn.softmax(scores, axis=-1)
        att = jnp.einsum("bhnm,bdhm->bdhn", prob, v4, **hp)
        msg = conv1d(p["wm"], p["bm"], att.reshape(B, D, N))
        cat = jnp.concatenate([x, msg], axis=1)
        z1 = conv1d(p["w1"], p["b1"], cat)
        mean = jnp.mean(z1, axis=(0, 2), keepdims=True)
        var = jnp.mean((z1 - mean) ** 2, axis=(0, 2), keepdims=True)
        h1 = (z1 - mean) / jnp.sqrt(var + bn_eps)
        h1 = h1 * p["gamma"][None, :, None] + p["beta"][None, :, None]
        h1 = jnp.maximum(h1, 0.0)
        x = x + conv1d(p["w2"], p["b2"], h1)
    return x


if __name__ == "__main__":
    B, D, N = 2, 32, 16          # batch, feature_dim, num klines (sequence)
    num_heads = 4
    layer_names = ["self", "self"]

    key = jax.random.PRNGKey(0)
    kx, kp = jax.random.split(key)
    layer_params = [make_layer_params(k, D)
                    for k in jax.random.split(kp, len(layer_names))]
    kline_desc = jax.random.normal(kx, (B, D, N), jnp.float32)

    # Weight plumbing hoisted out of the forward path (done once).
    prepared = [prepare_layer(p, num_heads) for p in layer_params]

    fwd = jax.jit(functools.partial(self_attentional_layer_pallas,
                                    num_heads=num_heads))
    out = jax.block_until_ready(fwd(kline_desc, prepared))

    ref = jax.block_until_ready(ref_forward(kline_desc, layer_params, num_heads))
    max_err = float(jnp.max(jnp.abs(out - ref)))
    ref_scale = float(jnp.max(jnp.abs(ref)))
    assert out.shape == (B, D, N)
    # Tolerance accounts for bf16 matmul operands + approx softmax reciprocal
    # (accumulation and BN statistics are f32).
    assert max_err < 2e-2 * max(1.0, ref_scale), \
        f"mismatch vs reference: max abs err = {max_err} (ref scale {ref_scale})"

    print("KERNEL_OK")
</pallas_src>

<mosaic_0001>
module attributes {stable_mosaic.version = 11 : i64} {
  func.func @_kv_proj_kernel(%arg0: i32, %arg1: i32, %arg2: memref<1x32x16xf32, #tpu.memory_space<vmem>>, %arg3: memref<4x8x32xbf16, #tpu.memory_space<vmem>>, %arg4: memref<4x8x1xf32, #tpu.memory_space<vmem>>, %arg5: memref<4x8x32xbf16, #tpu.memory_space<vmem>>, %arg6: memref<4x8x1xf32, #tpu.memory_space<vmem>>, %arg7: memref<1x4x8x16xbf16, #tpu.memory_space<vmem>>, %arg8: memref<1x4x8x16xbf16, #tpu.memory_space<vmem>>) attributes {dimension_semantics = [#tpu.dimension_semantics<parallel>, #tpu.dimension_semantics<parallel>], iteration_bounds = array<i64: 2, 1>, scalar_prefetch = 0 : i64, scratch_operands = 0 : i64, tpu.core_type = #tpu.core_type<tc>, window_params = [{transform_indices = @transform_0, window_bounds = array<i64: 1, 32, 16>}, {pipeline_mode = #tpu.pipeline_mode<synchronous>, transform_indices = @transform_1, window_bounds = array<i64: 4, 8, 32>}, {pipeline_mode = #tpu.pipeline_mode<synchronous>, transform_indices = @transform_2, window_bounds = array<i64: 4, 8, 1>}, {pipeline_mode = #tpu.pipeline_mode<synchronous>, transform_indices = @transform_3, window_bounds = array<i64: 4, 8, 32>}, {pipeline_mode = #tpu.pipeline_mode<synchronous>, transform_indices = @transform_4, window_bounds = array<i64: 4, 8, 1>}, {transform_indices = @transform_5, window_bounds = array<i64: 1, 4, 8, 16>}, {transform_indices = @transform_6, window_bounds = array<i64: 1, 4, 8, 16>}]} {
    %c0 = arith.constant 0 : index
    %c0_0 = arith.constant 0 : index
    %c0_1 = arith.constant 0 : index
    %0 = vector.load %arg2[%c0, %c0_0, %c0_1] : memref<1x32x16xf32, #tpu.memory_space<vmem>>, vector<1x32x16xf32>
    %1 = vector.shape_cast %0 : vector<1x32x16xf32> to vector<32x16xf32>
    %2 = arith.truncf %1 : vector<32x16xf32> to vector<32x16xbf16>
    %c0_2 = arith.constant 0 : index
    %c0_3 = arith.constant 0 : index
    %c0_4 = arith.constant 0 : index
    %3 = vector.load %arg3[%c0_2, %c0_3, %c0_4] : memref<4x8x32xbf16, #tpu.memory_space<vmem>>, vector<1x8x32xbf16>
    %4 = vector.shape_cast %3 : vector<1x8x32xbf16> to vector<8x32xbf16>
    %cst = arith.constant dense<0.000000e+00> : vector<8x16xf32>
    %5 = tpu.matmul %4, %2, %cst {dimension_numbers = #tpu.dot_dimension_numbers<[1], [0], [0], [1], [0, 0, 1, 1], [], []>} : vector<8x32xbf16>, vector<32x16xbf16>, vector<8x16xf32> -> vector<8x16xf32>
    %c0_5 = arith.constant 0 : index
    %c0_6 = arith.constant 0 : index
    %c0_7 = arith.constant 0 : index
    %6 = vector.load %arg4[%c0_5, %c0_6, %c0_7] : memref<4x8x1xf32, #tpu.memory_space<vmem>>, vector<1x8x1xf32>
    %7 = vector.shape_cast %6 : vector<1x8x1xf32> to vector<8x1xf32>
    %8 = vector.broadcast %7 : vector<8x1xf32> to vector<8x16xf32>
    %9 = arith.addf %5, %8 : vector<8x16xf32>
    %c0_8 = arith.constant 0 : index
    %c0_9 = arith.constant 0 : index
    %c0_10 = arith.constant 0 : index
    %10 = vector.load %arg5[%c0_8, %c0_9, %c0_10] : memref<4x8x32xbf16, #tpu.memory_space<vmem>>, vector<1x8x32xbf16>
    %11 = vector.shape_cast %10 : vector<1x8x32xbf16> to vector<8x32xbf16>
    %cst_11 = arith.constant dense<0.000000e+00> : vector<8x16xf32>
    %12 = tpu.matmul %11, %2, %cst_11 {dimension_numbers = #tpu.dot_dimension_numbers<[1], [0], [0], [1], [0, 0, 1, 1], [], []>} : vector<8x32xbf16>, vector<32x16xbf16>, vector<8x16xf32> -> vector<8x16xf32>
    %c0_12 = arith.constant 0 : index
    %c0_13 = arith.constant 0 : index
    %c0_14 = arith.constant 0 : index
    %13 = vector.load %arg6[%c0_12, %c0_13, %c0_14] : memref<4x8x1xf32, #tpu.memory_space<vmem>>, vector<1x8x1xf32>
    %14 = vector.shape_cast %13 : vector<1x8x1xf32> to vector<8x1xf32>
    %15 = vector.broadcast %14 : vector<8x1xf32> to vector<8x16xf32>
    %16 = arith.addf %12, %15 : vector<8x16xf32>
    %17 = arith.truncf %9 : vector<8x16xf32> to vector<8x16xbf16>
    %c0_15 = arith.constant 0 : index
    %c0_16 = arith.constant 0 : index
    %c0_17 = arith.constant 0 : index
    %c0_18 = arith.constant 0 : index
    %18 = vector.load %arg7[%c0_15, %c0_16, %c0_17, %c0_18] : memref<1x4x8x16xbf16, #tpu.memory_space<vmem>>, vector<1x1x8x16xbf16>
    %19 = vector.shape_cast %18 : vector<1x1x8x16xbf16> to vector<8x16xbf16>
    %20 = vector.shape_cast %17 : vector<8x16xbf16> to vector<1x1x8x16xbf16>
    tpu.vector_store %arg7[%c0_15, %c0_16, %c0_17, %c0_18], %20 {strides = array<i32>} : memref<1x4x8x16xbf16, #tpu.memory_space<vmem>>, vector<1x1x8x16xbf16>,
    %21 = arith.truncf %16 : vector<8x16xf32> to vector<8x16xbf16>
    %c0_19 = arith.constant 0 : index
    %c0_20 = arith.constant 0 : index
    %c0_21 = arith.constant 0 : index
    %c0_22 = arith.constant 0 : index
    %22 = vector.load %arg8[%c0_19, %c0_20, %c0_21, %c0_22] : memref<1x4x8x16xbf16, #tpu.memory_space<vmem>>, vector<1x1x8x16xbf16>
    %23 = vector.shape_cast %22 : vector<1x1x8x16xbf16> to vector<8x16xbf16>
    %24 = vector.shape_cast %21 : vector<8x16xbf16> to vector<1x1x8x16xbf16>
    tpu.vector_store %arg8[%c0_19, %c0_20, %c0_21, %c0_22], %24 {strides = array<i32>} : memref<1x4x8x16xbf16, #tpu.memory_space<vmem>>, vector<1x1x8x16xbf16>,
    %c1 = arith.constant 1 : index
    %c0_23 = arith.constant 0 : index
    %c0_24 = arith.constant 0 : index
    %25 = vector.load %arg3[%c1, %c0_23, %c0_24] : memref<4x8x32xbf16, #tpu.memory_space<vmem>>, vector<1x8x32xbf16>
    %26 = vector.shape_cast %25 : vector<1x8x32xbf16> to vector<8x32xbf16>
    %cst_25 = arith.constant dense<0.000000e+00> : vector<8x16xf32>
    %27 = tpu.matmul %26, %2, %cst_25 {dimension_numbers = #tpu.dot_dimension_numbers<[1], [0], [0], [1], [0, 0, 1, 1], [], []>} : vector<8x32xbf16>, vector<32x16xbf16>, vector<8x16xf32> -> vector<8x16xf32>
    %c1_26 = arith.constant 1 : index
    %c0_27 = arith.constant 0 : index
    %c0_28 = arith.constant 0 : index
    %28 = vector.load %arg4[%c1_26, %c0_27, %c0_28] : memref<4x8x1xf32, #tpu.memory_space<vmem>>, vector<1x8x1xf32>
    %29 = vector.shape_cast %28 : vector<1x8x1xf32> to vector<8x1xf32>
    %30 = vector.broadcast %29 : vector<8x1xf32> to vector<8x16xf32>
    %31 = arith.addf %27, %30 : vector<8x16xf32>
    %c1_29 = arith.constant 1 : index
    %c0_30 = arith.constant 0 : index
    %c0_31 = arith.constant 0 : index
    %32 = vector.load %arg5[%c1_29, %c0_30, %c0_31] : memref<4x8x32xbf16, #tpu.memory_space<vmem>>, vector<1x8x32xbf16>
    %33 = vector.shape_cast %32 : vector<1x8x32xbf16> to vector<8x32xbf16>
    %cst_32 = arith.constant dense<0.000000e+00> : vector<8x16xf32>
    %34 = tpu.matmul %33, %2, %cst_32 {dimension_numbers = #tpu.dot_dimension_numbers<[1], [0], [0], [1], [0, 0, 1, 1], [], []>} : vector<8x32xbf16>, vector<32x16xbf16>, vector<8x16xf32> -> vector<8x16xf32>
    %c1_33 = arith.constant 1 : index
    %c0_34 = arith.constant 0 : index
    %c0_35 = arith.constant 0 : index
    %35 = vector.load %arg6[%c1_33, %c0_34, %c0_35] : memref<4x8x1xf32, #tpu.memory_space<vmem>>, vector<1x8x1xf32>
    %36 = vector.shape_cast %35 : vector<1x8x1xf32> to vector<8x1xf32>
    %37 = vector.broadcast %36 : vector<8x1xf32> to vector<8x16xf32>
    %38 = arith.addf %34, %37 : vector<8x16xf32>
    %39 = arith.truncf %31 : vector<8x16xf32> to vector<8x16xbf16>
    %c0_36 = arith.constant 0 : index
    %c1_37 = arith.constant 1 : index
    %c0_38 = arith.constant 0 : index
    %c0_39 = arith.constant 0 : index
    %40 = vector.load %arg7[%c0_36, %c1_37, %c0_38, %c0_39] : memref<1x4x8x16xbf16, #tpu.memory_space<vmem>>, vector<1x1x8x16xbf16>
    %41 = vector.shape_cast %40 : vector<1x1x8x16xbf16> to vector<8x16xbf16>
    %42 = vector.shape_cast %39 : vector<8x16xbf16> to vector<1x1x8x16xbf16>
    tpu.vector_store %arg7[%c0_36, %c1_37, %c0_38, %c0_39], %42 {strides = array<i32>} : memref<1x4x8x16xbf16, #tpu.memory_space<vmem>>, vector<1x1x8x16xbf16>,
    %43 = arith.truncf %38 : vector<8x16xf32> to vector<8x16xbf16>
    %c0_40 = arith.constant 0 : index
    %c1_41 = arith.constant 1 : index
    %c0_42 = arith.constant 0 : index
    %c0_43 = arith.constant 0 : index
    %44 = vector.load %arg8[%c0_40, %c1_41, %c0_42, %c0_43] : memref<1x4x8x16xbf16, #tpu.memory_space<vmem>>, vector<1x1x8x16xbf16>
    %45 = vector.shape_cast %44 : vector<1x1x8x16xbf16> to vector<8x16xbf16>
    %46 = vector.shape_cast %43 : vector<8x16xbf16> to vector<1x1x8x16xbf16>
    tpu.vector_store %arg8[%c0_40, %c1_41, %c0_42, %c0_43], %46 {strides = array<i32>} : memref<1x4x8x16xbf16, #tpu.memory_space<vmem>>, vector<1x1x8x16xbf16>,
    %c2 = arith.constant 2 : index
    %c0_44 = arith.constant 0 : index
    %c0_45 = arith.constant 0 : index
    %47 = vector.load %arg3[%c2, %c0_44, %c0_45] : memref<4x8x32xbf16, #tpu.memory_space<vmem>>, vector<1x8x32xbf16>
    %48 = vector.shape_cast %47 : vector<1x8x32xbf16> to vector<8x32xbf16>
    %cst_46 = arith.constant dense<0.000000e+00> : vector<8x16xf32>
    %49 = tpu.matmul %48, %2, %cst_46 {dimension_numbers = #tpu.dot_dimension_numbers<[1], [0], [0], [1], [0, 0, 1, 1], [], []>} : vector<8x32xbf16>, vector<32x16xbf16>, vector<8x16xf32> -> vector<8x16xf32>
    %c2_47 = arith.constant 2 : index
    %c0_48 = arith.constant 0 : index
    %c0_49 = arith.constant 0 : index
    %50 = vector.load %arg4[%c2_47, %c0_48, %c0_49] : memref<4x8x1xf32, #tpu.memory_space<vmem>>, vector<1x8x1xf32>
    %51 = vector.shape_cast %50 : vector<1x8x1xf32> to vector<8x1xf32>
    %52 = vector.broadcast %51 : vector<8x1xf32> to vector<8x16xf32>
    %53 = arith.addf %49, %52 : vector<8x16xf32>
    %c2_50 = arith.constant 2 : index
    %c0_51 = arith.constant 0 : index
    %c0_52 = arith.constant 0 : index
    %54 = vector.load %arg5[%c2_50, %c0_51, %c0_52] : memref<4x8x32xbf16, #tpu.memory_space<vmem>>, vector<1x8x32xbf16>
    %55 = vector.shape_cast %54 : vector<1x8x32xbf16> to vector<8x32xbf16>
    %cst_53 = arith.constant dense<0.000000e+00> : vector<8x16xf32>
    %56 = tpu.matmul %55, %2, %cst_53 {dimension_numbers = #tpu.dot_dimension_numbers<[1], [0], [0], [1], [0, 0, 1, 1], [], []>} : vector<8x32xbf16>, vector<32x16xbf16>, vector<8x16xf32> -> vector<8x16xf32>
    %c2_54 = arith.constant 2 : index
    %c0_55 = arith.constant 0 : index
    %c0_56 = arith.constant 0 : index
    %57 = vector.load %arg6[%c2_54, %c0_55, %c0_56] : memref<4x8x1xf32, #tpu.memory_space<vmem>>, vector<1x8x1xf32>
    %58 = vector.shape_cast %57 : vector<1x8x1xf32> to vector<8x1xf32>
    %59 = vector.broadcast %58 : vector<8x1xf32> to vector<8x16xf32>
    %60 = arith.addf %56, %59 : vector<8x16xf32>
    %61 = arith.truncf %53 : vector<8x16xf32> to vector<8x16xbf16>
    %c0_57 = arith.constant 0 : index
    %c2_58 = arith.constant 2 : index
    %c0_59 = arith.constant 0 : index
    %c0_60 = arith.constant 0 : index
    %62 = vector.load %arg7[%c0_57, %c2_58, %c0_59, %c0_60] : memref<1x4x8x16xbf16, #tpu.memory_space<vmem>>, vector<1x1x8x16xbf16>
    %63 = vector.shape_cast %62 : vector<1x1x8x16xbf16> to vector<8x16xbf16>
    %64 = vector.shape_cast %61 : vector<8x16xbf16> to vector<1x1x8x16xbf16>
    tpu.vector_store %arg7[%c0_57, %c2_58, %c0_59, %c0_60], %64 {strides = array<i32>} : memref<1x4x8x16xbf16, #tpu.memory_space<vmem>>, vector<1x1x8x16xbf16>,
    %65 = arith.truncf %60 : vector<8x16xf32> to vector<8x16xbf16>
    %c0_61 = arith.constant 0 : index
    %c2_62 = arith.constant 2 : index
    %c0_63 = arith.constant 0 : index
    %c0_64 = arith.constant 0 : index
    %66 = vector.load %arg8[%c0_61, %c2_62, %c0_63, %c0_64] : memref<1x4x8x16xbf16, #tpu.memory_space<vmem>>, vector<1x1x8x16xbf16>
    %67 = vector.shape_cast %66 : vector<1x1x8x16xbf16> to vector<8x16xbf16>
    %68 = vector.shape_cast %65 : vector<8x16xbf16> to vector<1x1x8x16xbf16>
    tpu.vector_store %arg8[%c0_61, %c2_62, %c0_63, %c0_64], %68 {strides = array<i32>} : memref<1x4x8x16xbf16, #tpu.memory_space<vmem>>, vector<1x1x8x16xbf16>,
    %c3 = arith.constant 3 : index
    %c0_65 = arith.constant 0 : index
    %c0_66 = arith.constant 0 : index
    %69 = vector.load %arg3[%c3, %c0_65, %c0_66] : memref<4x8x32xbf16, #tpu.memory_space<vmem>>, vector<1x8x32xbf16>
    %70 = vector.shape_cast %69 : vector<1x8x32xbf16> to vector<8x32xbf16>
    %cst_67 = arith.constant dense<0.000000e+00> : vector<8x16xf32>
    %71 = tpu.matmul %70, %2, %cst_67 {dimension_numbers = #tpu.dot_dimension_numbers<[1], [0], [0], [1], [0, 0, 1, 1], [], []>} : vector<8x32xbf16>, vector<32x16xbf16>, vector<8x16xf32> -> vector<8x16xf32>
    %c3_68 = arith.constant 3 : index
    %c0_69 = arith.constant 0 : index
    %c0_70 = arith.constant 0 : index
    %72 = vector.load %arg4[%c3_68, %c0_69, %c0_70] : memref<4x8x1xf32, #tpu.memory_space<vmem>>, vector<1x8x1xf32>
    %73 = vector.shape_cast %72 : vector<1x8x1xf32> to vector<8x1xf32>
    %74 = vector.broadcast %73 : vector<8x1xf32> to vector<8x16xf32>
    %75 = arith.addf %71, %74 : vector<8x16xf32>
    %c3_71 = arith.constant 3 : index
    %c0_72 = arith.constant 0 : index
    %c0_73 = arith.constant 0 : index
    %76 = vector.load %arg5[%c3_71, %c0_72, %c0_73] : memref<4x8x32xbf16, #tpu.memory_space<vmem>>, vector<1x8x32xbf16>
    %77 = vector.shape_cast %76 : vector<1x8x32xbf16> to vector<8x32xbf16>
    %cst_74 = arith.constant dense<0.000000e+00> : vector<8x16xf32>
    %78 = tpu.matmul %77, %2, %cst_74 {dimension_numbers = #tpu.dot_dimension_numbers<[1], [0], [0], [1], [0, 0, 1, 1], [], []>} : vector<8x32xbf16>, vector<32x16xbf16>, vector<8x16xf32> -> vector<8x16xf32>
    %c3_75 = arith.constant 3 : index
    %c0_76 = arith.constant 0 : index
    %c0_77 = arith.constant 0 : index
    %79 = vector.load %arg6[%c3_75, %c0_76, %c0_77] : memref<4x8x1xf32, #tpu.memory_space<vmem>>, vector<1x8x1xf32>
    %80 = vector.shape_cast %79 : vector<1x8x1xf32> to vector<8x1xf32>
    %81 = vector.broadcast %80 : vector<8x1xf32> to vector<8x16xf32>
    %82 = arith.addf %78, %81 : vector<8x16xf32>
    %83 = arith.truncf %75 : vector<8x16xf32> to vector<8x16xbf16>
    %c0_78 = arith.constant 0 : index
    %c3_79 = arith.constant 3 : index
    %c0_80 = arith.constant 0 : index
    %c0_81 = arith.constant 0 : index
    %84 = vector.load %arg7[%c0_78, %c3_79, %c0_80, %c0_81] : memref<1x4x8x16xbf16, #tpu.memory_space<vmem>>, vector<1x1x8x16xbf16>
    %85 = vector.shape_cast %84 : vector<1x1x8x16xbf16> to vector<8x16xbf16>
    %86 = vector.shape_cast %83 : vector<8x16xbf16> to vector<1x1x8x16xbf16>
    tpu.vector_store %arg7[%c0_78, %c3_79, %c0_80, %c0_81], %86 {strides = array<i32>} : memref<1x4x8x16xbf16, #tpu.memory_space<vmem>>, vector<1x1x8x16xbf16>,
    %87 = arith.truncf %82 : vector<8x16xf32> to vector<8x16xbf16>
    %c0_82 = arith.constant 0 : index
    %c3_83 = arith.constant 3 : index
    %c0_84 = arith.constant 0 : index
    %c0_85 = arith.constant 0 : index
    %88 = vector.load %arg8[%c0_82, %c3_83, %c0_84, %c0_85] : memref<1x4x8x16xbf16, #tpu.memory_space<vmem>>, vector<1x1x8x16xbf16>
    %89 = vector.shape_cast %88 : vector<1x1x8x16xbf16> to vector<8x16xbf16>
    %90 = vector.shape_cast %87 : vector<8x16xbf16> to vector<1x1x8x16xbf16>
    tpu.vector_store %arg8[%c0_82, %c3_83, %c0_84, %c0_85], %90 {strides = array<i32>} : memref<1x4x8x16xbf16, #tpu.memory_space<vmem>>, vector<1x1x8x16xbf16>,
    return
  }
  func.func @transform_0(%arg0: i32, %arg1: i32) -> (i32, i32, i32) {
    %c0_i32 = arith.constant 0 : i32
    %c0_i32_0 = arith.constant 0 : i32
    return %arg0, %c0_i32, %arg1 : i32, i32, i32
  }
  func.func @transform_1(%arg0: i32, %arg1: i32) -> (i32, i32, i32) {
    %c0_i32 = arith.constant 0 : i32
    %c0_i32_0 = arith.constant 0 : i32
    %c0_i32_1 = arith.constant 0 : i32
    %c0_i32_2 = arith.constant 0 : i32
    return %c0_i32, %c0_i32_0, %c0_i32_1 : i32, i32, i32
  }
  func.func @transform_2(%arg0: i32, %arg1: i32) -> (i32, i32, i32) {
    %c0_i32 = arith.constant 0 : i32
    %c0_i32_0 = arith.constant 0 : i32
    %c0_i32_1 = arith.constant 0 : i32
    %c0_i32_2 = arith.constant 0 : i32
    return %c0_i32, %c0_i32_0, %c0_i32_1 : i32, i32, i32
  }
  func.func @transform_3(%arg0: i32, %arg1: i32) -> (i32, i32, i32) {
    %c0_i32 = arith.constant 0 : i32
    %c0_i32_0 = arith.constant 0 : i32
    %c0_i32_1 = arith.constant 0 : i32
    %c0_i32_2 = arith.constant 0 : i32
    return %c0_i32, %c0_i32_0, %c0_i32_1 : i32, i32, i32
  }
  func.func @transform_4(%arg0: i32, %arg1: i32) -> (i32, i32, i32) {
    %c0_i32 = arith.constant 0 : i32
    %c0_i32_0 = arith.constant 0 : i32
    %c0_i32_1 = arith.constant 0 : i32
    %c0_i32_2 = arith.constant 0 : i32
    return %c0_i32, %c0_i32_0, %c0_i32_1 : i32, i32, i32
  }
  func.func @transform_5(%arg0: i32, %arg1: i32) -> (i32, i32, i32, i32) {
    %c0_i32 = arith.constant 0 : i32
    %c0_i32_0 = arith.constant 0 : i32
    %c0_i32_1 = arith.constant 0 : i32
    return %arg0, %c0_i32, %c0_i32_0, %arg1 : i32, i32, i32, i32
  }
  func.func @transform_6(%arg0: i32, %arg1: i32) -> (i32, i32, i32, i32) {
    %c0_i32 = arith.constant 0 : i32
    %c0_i32_0 = arith.constant 0 : i32
    %c0_i32_1 = arith.constant 0 : i32
    return %arg0, %c0_i32, %c0_i32_0, %arg1 : i32, i32, i32, i32
  }
}

module attributes {stable_mosaic.version = 11 : i64} {
  func.func @_attn_mlp1_kernel(%arg0: i32, %arg1: i32, %arg2: memref<1x32x16xf32, #tpu.memory_space<vmem>>, %arg3: memref<1x4x8x16xbf16, #tpu.memory_space<vmem>>, %arg4: memref<1x4x8x16xbf16, #tpu.memory_space<vmem>>, %arg5: memref<4x8x32xbf16, #tpu.memory_space<vmem>>, %arg6: memref<4x8x1xf32, #tpu.memory_space<vmem>>, %arg7: memref<32x32xbf16, #tpu.memory_space<vmem>>, %arg8: memref<32x1xf32, #tpu.memory_space<vmem>>, %arg9: memref<64x32xbf16, #tpu.memory_space<vmem>>, %arg10: memref<64x32xbf16, #tpu.memory_space<vmem>>, %arg11: memref<64x1xf32, #tpu.memory_space<vmem>>, %arg12: memref<1x64x16xf32, #tpu.memory_space<vmem>>, %arg13: memref<1x1x64x2xf32, #tpu.memory_space<vmem>>) attributes {dimension_semantics = [#tpu.dimension_semantics<parallel>, #tpu.dimension_semantics<parallel>], iteration_bounds = array<i64: 2, 1>, scalar_prefetch = 0 : i64, scratch_operands = 0 : i64, tpu.core_type = #tpu.core_type<tc>, window_params = [{transform_indices = @transform_0, window_bounds = array<i64: 1, 32, 16>}, {transform_indices = @transform_1, window_bounds = array<i64: 1, 4, 8, 16>}, {transform_indices = @transform_2, window_bounds = array<i64: 1, 4, 8, 16>}, {pipeline_mode = #tpu.pipeline_mode<synchronous>, transform_indices = @transform_3, window_bounds = array<i64: 4, 8, 32>}, {pipeline_mode = #tpu.pipeline_mode<synchronous>, transform_indices = @transform_4, window_bounds = array<i64: 4, 8, 1>}, {pipeline_mode = #tpu.pipeline_mode<synchronous>, transform_indices = @transform_5, window_bounds = array<i64: 32, 32>}, {pipeline_mode = #tpu.pipeline_mode<synchronous>, transform_indices = @transform_6, window_bounds = array<i64: 32, 1>}, {pipeline_mode = #tpu.pipeline_mode<synchronous>, transform_indices = @transform_7, window_bounds = array<i64: 64, 32>}, {pipeline_mode = #tpu.pipeline_mode<synchronous>, transform_indices = @transform_8, window_bounds = array<i64: 64, 32>}, {pipeline_mode = #tpu.pipeline_mode<synchronous>, transform_indices = @transform_9, window_bounds = array<i64: 64, 1>}, {transform_indices = @transform_10, window_bounds = array<i64: 1, 64, 16>}, {transform_indices = @transform_11, window_bounds = array<i64: 1, 1, 64, 2>}]} {
    %c0 = arith.constant 0 : index
    %c0_0 = arith.constant 0 : index
    %c0_1 = arith.constant 0 : index
    %0 = vector.load %arg2[%c0, %c0_0, %c0_1] : memref<1x32x16xf32, #tpu.memory_space<vmem>>, vector<1x32x16xf32>
    %1 = vector.shape_cast %0 : vector<1x32x16xf32> to vector<32x16xf32>
    %2 = arith.truncf %1 : vector<32x16xf32> to vector<32x16xbf16>
    %c0_2 = arith.constant 0 : index
    %c0_3 = arith.constant 0 : index
    %c0_4 = arith.constant 0 : index
    %3 = vector.load %arg5[%c0_2, %c0_3, %c0_4] : memref<4x8x32xbf16, #tpu.memory_space<vmem>>, vector<1x8x32xbf16>
    %4 = vector.shape_cast %3 : vector<1x8x32xbf16> to vector<8x32xbf16>
    %cst = arith.constant dense<0.000000e+00> : vector<8x16xf32>
    %5 = tpu.matmul %4, %2, %cst {dimension_numbers = #tpu.dot_dimension_numbers<[1], [0], [0], [1], [0, 0, 1, 1], [], []>} : vector<8x32xbf16>, vector<32x16xbf16>, vector<8x16xf32> -> vector<8x16xf32>
    %c0_5 = arith.constant 0 : index
    %c0_6 = arith.constant 0 : index
    %c0_7 = arith.constant 0 : index
    %6 = vector.load %arg6[%c0_5, %c0_6, %c0_7] : memref<4x8x1xf32, #tpu.memory_space<vmem>>, vector<1x8x1xf32>
    %7 = vector.shape_cast %6 : vector<1x8x1xf32> to vector<8x1xf32>
    %8 = vector.broadcast %7 : vector<8x1xf32> to vector<8x16xf32>
    %9 = arith.addf %5, %8 : vector<8x16xf32>
    %10 = tpu.transpose %9, [1, 0] : vector<8x16xf32> -> vector<16x8xf32>
    %11 = arith.truncf %10 : vector<16x8xf32> to vector<16x8xbf16>
    %c0_8 = arith.constant 0 : index
    %c0_9 = arith.constant 0 : index
    %c0_10 = arith.constant 0 : index
    %c0_11 = arith.constant 0 : index
    %12 = vector.load %arg3[%c0_8, %c0_9, %c0_10, %c0_11] : memref<1x4x8x16xbf16, #tpu.memory_space<vmem>>, vector<1x1x8x16xbf16>
    %13 = vector.shape_cast %12 : vector<1x1x8x16xbf16> to vector<8x16xbf16>
    %cst_12 = arith.constant dense<0.000000e+00> : vector<16x16xf32>
    %14 = tpu.matmul %11, %13, %cst_12 {dimension_numbers = #tpu.dot_dimension_numbers<[1], [0], [0], [1], [0, 0, 1, 1], [], []>} : vector<16x8xbf16>, vector<8x16xbf16>, vector<16x16xf32> -> vector<16x16xf32>
    %cst_13 = arith.constant dense<0xFF800000> : vector<16xf32>
    %15 = vector.multi_reduction <maximumf>, %14, %cst_13 [1] : vector<16x16xf32> to vector<16xf32>
    %16 = vector.shape_cast %15 : vector<16xf32> to vector<16x1xf32>
    %17 = vector.broadcast %16 : vector<16x1xf32> to vector<16x16xf32>
    %18 = arith.subf %14, %17 : vector<16x16xf32>
    %19 = math.exp %18 : vector<16x16xf32>
    %cst_14 = arith.constant dense<0.000000e+00> : vector<16xf32>
    %20 = vector.multi_reduction <add>, %19, %cst_14 [1] : vector<16x16xf32> to vector<16xf32>
    %21 = vector.shape_cast %20 : vector<16xf32> to vector<16x1xf32>
    %22 = tpu.reciprocal %21 {approx = true} : vector<16x1xf32> -> vector<16x1xf32>
    %23 = vector.broadcast %22 : vector<16x1xf32> to vector<16x16xf32>
    %24 = arith.mulf %19, %23 : vector<16x16xf32>
    %c0_15 = arith.constant 0 : index
    %c0_16 = arith.constant 0 : index
    %c0_17 = arith.constant 0 : index
    %c0_18 = arith.constant 0 : index
    %25 = vector.load %arg4[%c0_15, %c0_16, %c0_17, %c0_18] : memref<1x4x8x16xbf16, #tpu.memory_space<vmem>>, vector<1x1x8x16xbf16>
    %26 = vector.shape_cast %25 : vector<1x1x8x16xbf16> to vector<8x16xbf16>
    %27 = arith.truncf %24 : vector<16x16xf32> to vector<16x16xbf16>
    "tpu.trace_start"() <{level = 10 : i32, message = "dk,qk->dq"}> : () -> ()
    %cst_19 = arith.constant dense<0.000000e+00> : vector<8x16xf32>
    %28 = tpu.matmul %26, %27, %cst_19 {dimension_numbers = #tpu.dot_dimension_numbers<[1], [1], [0], [0], [0, 0, 1, 0], [], []>} : vector<8x16xbf16>, vector<16x16xbf16>, vector<8x16xf32> -> vector<8x16xf32>
    "tpu.trace_stop"() : () -> ()
    %c1 = arith.constant 1 : index
    %c0_20 = arith.constant 0 : index
    %c0_21 = arith.constant 0 : index
    %29 = vector.load %arg5[%c1, %c0_20, %c0_21] : memref<4x8x32xbf16, #tpu.memory_space<vmem>>, vector<1x8x32xbf16>
    %30 = vector.shape_cast %29 : vector<1x8x32xbf16> to vector<8x32xbf16>
    %cst_22 = arith.constant dense<0.000000e+00> : vector<8x16xf32>
    %31 = tpu.matmul %30, %2, %cst_22 {dimension_numbers = #tpu.dot_dimension_numbers<[1], [0], [0], [1], [0, 0, 1, 1], [], []>} : vector<8x32xbf16>, vector<32x16xbf16>, vector<8x16xf32> -> vector<8x16xf32>
    %c1_23 = arith.constant 1 : index
    %c0_24 = arith.constant 0 : index
    %c0_25 = arith.constant 0 : index
    %32 = vector.load %arg6[%c1_23, %c0_24, %c0_25] : memref<4x8x1xf32, #tpu.memory_space<vmem>>, vector<1x8x1xf32>
    %33 = vector.shape_cast %32 : vector<1x8x1xf32> to vector<8x1xf32>
    %34 = vector.broadcast %33 : vector<8x1xf32> to vector<8x16xf32>
    %35 = arith.addf %31, %34 : vector<8x16xf32>
    %36 = tpu.transpose %35, [1, 0] : vector<8x16xf32> -> vector<16x8xf32>
    %37 = arith.truncf %36 : vector<16x8xf32> to vector<16x8xbf16>
    %c0_26 = arith.constant 0 : index
    %c1_27 = arith.constant 1 : index
    %c0_28 = arith.constant 0 : index
    %c0_29 = arith.constant 0 : index
    %38 = vector.load %arg3[%c0_26, %c1_27, %c0_28, %c0_29] : memref<1x4x8x16xbf16, #tpu.memory_space<vmem>>, vector<1x1x8x16xbf16>
    %39 = vector.shape_cast %38 : vector<1x1x8x16xbf16> to vector<8x16xbf16>
    %cst_30 = arith.constant dense<0.000000e+00> : vector<16x16xf32>
    %40 = tpu.matmul %37, %39, %cst_30 {dimension_numbers = #tpu.dot_dimension_numbers<[1], [0], [0], [1], [0, 0, 1, 1], [], []>} : vector<16x8xbf16>, vector<8x16xbf16>, vector<16x16xf32> -> vector<16x16xf32>
    %cst_31 = arith.constant dense<0xFF800000> : vector<16xf32>
    %41 = vector.multi_reduction <maximumf>, %40, %cst_31 [1] : vector<16x16xf32> to vector<16xf32>
    %42 = vector.shape_cast %41 : vector<16xf32> to vector<16x1xf32>
    %43 = vector.broadcast %42 : vector<16x1xf32> to vector<16x16xf32>
    %44 = arith.subf %40, %43 : vector<16x16xf32>
    %45 = math.exp %44 : vector<16x16xf32>
    %cst_32 = arith.constant dense<0.000000e+00> : vector<16xf32>
    %46 = vector.multi_reduction <add>, %45, %cst_32 [1] : vector<16x16xf32> to vector<16xf32>
    %47 = vector.shape_cast %46 : vector<16xf32> to vector<16x1xf32>
    %48 = tpu.reciprocal %47 {approx = true} : vector<16x1xf32> -> vector<16x1xf32>
    %49 = vector.broadcast %48 : vector<16x1xf32> to vector<16x16xf32>
    %50 = arith.mulf %45, %49 : vector<16x16xf32>
    %c0_33 = arith.constant 0 : index
    %c1_34 = arith.constant 1 : index
    %c0_35 = arith.constant 0 : index
    %c0_36 = arith.constant 0 : index
    %51 = vector.load %arg4[%c0_33, %c1_34, %c0_35, %c0_36] : memref<1x4x8x16xbf16, #tpu.memory_space<vmem>>, vector<1x1x8x16xbf16>
    %52 = vector.shape_cast %51 : vector<1x1x8x16xbf16> to vector<8x16xbf16>
    %53 = arith.truncf %50 : vector<16x16xf32> to vector<16x16xbf16>
    "tpu.trace_start"() <{level = 10 : i32, message = "dk,qk->dq"}> : () -> ()
    %cst_37 = arith.constant dense<0.000000e+00> : vector<8x16xf32>
    %54 = tpu.matmul %52, %53, %cst_37 {dimension_numbers = #tpu.dot_dimension_numbers<[1], [1], [0], [0], [0, 0, 1, 0], [], []>} : vector<8x16xbf16>, vector<16x16xbf16>, vector<8x16xf32> -> vector<8x16xf32>
    "tpu.trace_stop"() : () -> ()
    %c2 = arith.constant 2 : index
    %c0_38 = arith.constant 0 : index
    %c0_39 = arith.constant 0 : index
    %55 = vector.load %arg5[%c2, %c0_38, %c0_39] : memref<4x8x32xbf16, #tpu.memory_space<vmem>>, vector<1x8x32xbf16>
    %56 = vector.shape_cast %55 : vector<1x8x32xbf16> to vector<8x32xbf16>
    %cst_40 = arith.constant dense<0.000000e+00> : vector<8x16xf32>
    %57 = tpu.matmul %56, %2, %cst_40 {dimension_numbers = #tpu.dot_dimension_numbers<[1], [0], [0], [1], [0, 0, 1, 1], [], []>} : vector<8x32xbf16>, vector<32x16xbf16>, vector<8x16xf32> -> vector<8x16xf32>
    %c2_41 = arith.constant 2 : index
    %c0_42 = arith.constant 0 : index
    %c0_43 = arith.constant 0 : index
    %58 = vector.load %arg6[%c2_41, %c0_42, %c0_43] : memref<4x8x1xf32, #tpu.memory_space<vmem>>, vector<1x8x1xf32>
    %59 = vector.shape_cast %58 : vector<1x8x1xf32> to vector<8x1xf32>
    %60 = vector.broadcast %59 : vector<8x1xf32> to vector<8x16xf32>
    %61 = arith.addf %57, %60 : vector<8x16xf32>
    %62 = tpu.transpose %61, [1, 0] : vector<8x16xf32> -> vector<16x8xf32>
    %63 = arith.truncf %62 : vector<16x8xf32> to vector<16x8xbf16>
    %c0_44 = arith.constant 0 : index
    %c2_45 = arith.constant 2 : index
    %c0_46 = arith.constant 0 : index
    %c0_47 = arith.constant 0 : index
    %64 = vector.load %arg3[%c0_44, %c2_45, %c0_46, %c0_47] : memref<1x4x8x16xbf16, #tpu.memory_space<vmem>>, vector<1x1x8x16xbf16>
    %65 = vector.shape_cast %64 : vector<1x1x8x16xbf16> to vector<8x16xbf16>
    %cst_48 = arith.constant dense<0.000000e+00> : vector<16x16xf32>
    %66 = tpu.matmul %63, %65, %cst_48 {dimension_numbers = #tpu.dot_dimension_numbers<[1], [0], [0], [1], [0, 0, 1, 1], [], []>} : vector<16x8xbf16>, vector<8x16xbf16>, vector<16x16xf32> -> vector<16x16xf32>
    %cst_49 = arith.constant dense<0xFF800000> : vector<16xf32>
    %67 = vector.multi_reduction <maximumf>, %66, %cst_49 [1] : vector<16x16xf32> to vector<16xf32>
    %68 = vector.shape_cast %67 : vector<16xf32> to vector<16x1xf32>
    %69 = vector.broadcast %68 : vector<16x1xf32> to vector<16x16xf32>
    %70 = arith.subf %66, %69 : vector<16x16xf32>
    %71 = math.exp %70 : vector<16x16xf32>
    %cst_50 = arith.constant dense<0.000000e+00> : vector<16xf32>
    %72 = vector.multi_reduction <add>, %71, %cst_50 [1] : vector<16x16xf32> to vector<16xf32>
    %73 = vector.shape_cast %72 : vector<16xf32> to vector<16x1xf32>
    %74 = tpu.reciprocal %73 {approx = true} : vector<16x1xf32> -> vector<16x1xf32>
    %75 = vector.broadcast %74 : vector<16x1xf32> to vector<16x16xf32>
    %76 = arith.mulf %71, %75 : vector<16x16xf32>
    %c0_51 = arith.constant 0 : index
    %c2_52 = arith.constant 2 : index
    %c0_53 = arith.constant 0 : index
    %c0_54 = arith.constant 0 : index
    %77 = vector.load %arg4[%c0_51, %c2_52, %c0_53, %c0_54] : memref<1x4x8x16xbf16, #tpu.memory_space<vmem>>, vector<1x1x8x16xbf16>
    %78 = vector.shape_cast %77 : vector<1x1x8x16xbf16> to vector<8x16xbf16>
    %79 = arith.truncf %76 : vector<16x16xf32> to vector<16x16xbf16>
    "tpu.trace_start"() <{level = 10 : i32, message = "dk,qk->dq"}> : () -> ()
    %cst_55 = arith.constant dense<0.000000e+00> : vector<8x16xf32>
    %80 = tpu.matmul %78, %79, %cst_55 {dimension_numbers = #tpu.dot_dimension_numbers<[1], [1], [0], [0], [0, 0, 1, 0], [], []>} : vector<8x16xbf16>, vector<16x16xbf16>, vector<8x16xf32> -> vector<8x16xf32>
    "tpu.trace_stop"() : () -> ()
    %c3 = arith.constant 3 : index
    %c0_56 = arith.constant 0 : index
    %c0_57 = arith.constant 0 : index
    %81 = vector.load %arg5[%c3, %c0_56, %c0_57] : memref<4x8x32xbf16, #tpu.memory_space<vmem>>, vector<1x8x32xbf16>
    %82 = vector.shape_cast %81 : vector<1x8x32xbf16> to vector<8x32xbf16>
    %cst_58 = arith.constant dense<0.000000e+00> : vector<8x16xf32>
    %83 = tpu.matmul %82, %2, %cst_58 {dimension_numbers = #tpu.dot_dimension_numbers<[1], [0], [0], [1], [0, 0, 1, 1], [], []>} : vector<8x32xbf16>, vector<32x16xbf16>, vector<8x16xf32> -> vector<8x16xf32>
    %c3_59 = arith.constant 3 : index
    %c0_60 = arith.constant 0 : index
    %c0_61 = arith.constant 0 : index
    %84 = vector.load %arg6[%c3_59, %c0_60, %c0_61] : memref<4x8x1xf32, #tpu.memory_space<vmem>>, vector<1x8x1xf32>
    %85 = vector.shape_cast %84 : vector<1x8x1xf32> to vector<8x1xf32>
    %86 = vector.broadcast %85 : vector<8x1xf32> to vector<8x16xf32>
    %87 = arith.addf %83, %86 : vector<8x16xf32>
    %88 = tpu.transpose %87, [1, 0] : vector<8x16xf32> -> vector<16x8xf32>
    %89 = arith.truncf %88 : vector<16x8xf32> to vector<16x8xbf16>
    %c0_62 = arith.constant 0 : index
    %c3_63 = arith.constant 3 : index
    %c0_64 = arith.constant 0 : index
    %c0_65 = arith.constant 0 : index
    %90 = vector.load %arg3[%c0_62, %c3_63, %c0_64, %c0_65] : memref<1x4x8x16xbf16, #tpu.memory_space<vmem>>, vector<1x1x8x16xbf16>
    %91 = vector.shape_cast %90 : vector<1x1x8x16xbf16> to vector<8x16xbf16>
    %cst_66 = arith.constant dense<0.000000e+00> : vector<16x16xf32>
    %92 = tpu.matmul %89, %91, %cst_66 {dimension_numbers = #tpu.dot_dimension_numbers<[1], [0], [0], [1], [0, 0, 1, 1], [], []>} : vector<16x8xbf16>, vector<8x16xbf16>, vector<16x16xf32> -> vector<16x16xf32>
    %cst_67 = arith.constant dense<0xFF800000> : vector<16xf32>
    %93 = vector.multi_reduction <maximumf>, %92, %cst_67 [1] : vector<16x16xf32> to vector<16xf32>
    %94 = vector.shape_cast %93 : vector<16xf32> to vector<16x1xf32>
    %95 = vector.broadcast %94 : vector<16x1xf32> to vector<16x16xf32>
    %96 = arith.subf %92, %95 : vector<16x16xf32>
    %97 = math.exp %96 : vector<16x16xf32>
    %cst_68 = arith.constant dense<0.000000e+00> : vector<16xf32>
    %98 = vector.multi_reduction <add>, %97, %cst_68 [1] : vector<16x16xf32> to vector<16xf32>
    %99 = vector.shape_cast %98 : vector<16xf32> to vector<16x1xf32>
    %100 = tpu.reciprocal %99 {approx = true} : vector<16x1xf32> -> vector<16x1xf32>
    %101 = vector.broadcast %100 : vector<16x1xf32> to vector<16x16xf32>
    %102 = arith.mulf %97, %101 : vector<16x16xf32>
    %c0_69 = arith.constant 0 : index
    %c3_70 = arith.constant 3 : index
    %c0_71 = arith.constant 0 : index
    %c0_72 = arith.constant 0 : index
    %103 = vector.load %arg4[%c0_69, %c3_70, %c0_71, %c0_72] : memref<1x4x8x16xbf16, #tpu.memory_space<vmem>>, vector<1x1x8x16xbf16>
    %104 = vector.shape_cast %103 : vector<1x1x8x16xbf16> to vector<8x16xbf16>
    %105 = arith.truncf %102 : vector<16x16xf32> to vector<16x16xbf16>
    "tpu.trace_start"() <{level = 10 : i32, message = "dk,qk->dq"}> : () -> ()
    %cst_73 = arith.constant dense<0.000000e+00> : vector<8x16xf32>
    %106 = tpu.matmul %104, %105, %cst_73 {dimension_numbers = #tpu.dot_dimension_numbers<[1], [1], [0], [0], [0, 0, 1, 0], [], []>} : vector<8x16xbf16>, vector<16x16xbf16>, vector<8x16xf32> -> vector<8x16xf32>
    "tpu.trace_stop"() : () -> ()
    %107 = tpu.concatenate %28, %54, %80, %106 in 0 : vector<8x16xf32>, vector<8x16xf32>, vector<8x16xf32>, vector<8x16xf32> -> vector<32x16xf32>
    %108 = arith.truncf %107 : vector<32x16xf32> to vector<32x16xbf16>
    %c0_74 = arith.constant 0 : index
    %c0_75 = arith.constant 0 : index
    %109 = vector.load %arg7[%c0_74, %c0_75] : memref<32x32xbf16, #tpu.memory_space<vmem>>, vector<32x32xbf16>
    %cst_76 = arith.constant dense<0.000000e+00> : vector<32x16xf32>
    %110 = tpu.matmul %109, %108, %cst_76 {dimension_numbers = #tpu.dot_dimension_numbers<[1], [0], [0], [1], [0, 0, 1, 1], [], []>} : vector<32x32xbf16>, vector<32x16xbf16>, vector<32x16xf32> -> vector<32x16xf32>
    %c0_77 = arith.constant 0 : index
    %c0_78 = arith.constant 0 : index
    %111 = vector.load %arg8[%c0_77, %c0_78] : memref<32x1xf32, #tpu.memory_space<vmem>>, vector<32x1xf32>
    %112 = vector.broadcast %111 : vector<32x1xf32> to vector<32x16xf32>
    %113 = arith.addf %110, %112 : vector<32x16xf32>
    %c0_79 = arith.constant 0 : index
    %c0_80 = arith.constant 0 : index
    %114 = vector.load %arg9[%c0_79, %c0_80] : memref<64x32xbf16, #tpu.memory_space<vmem>>, vector<64x32xbf16>
    %cst_81 = arith.constant dense<0.000000e+00> : vector<64x16xf32>
    %115 = tpu.matmul %114, %2, %cst_81 {dimension_numbers = #tpu.dot_dimension_numbers<[1], [0], [0], [1], [0, 0, 1, 1], [], []>} : vector<64x32xbf16>, vector<32x16xbf16>, vector<64x16xf32> -> vector<64x16xf32>
    %c0_82 = arith.constant 0 : index
    %c0_83 = arith.constant 0 : index
    %116 = vector.load %arg10[%c0_82, %c0_83] : memref<64x32xbf16, #tpu.memory_space<vmem>>, vector<64x32xbf16>
    %117 = arith.truncf %113 : vector<32x16xf32> to vector<32x16xbf16>
    %cst_84 = arith.constant dense<0.000000e+00> : vector<64x16xf32>
    %118 = tpu.matmul %116, %117, %cst_84 {dimension_numbers = #tpu.dot_dimension_numbers<[1], [0], [0], [1], [0, 0, 1, 1], [], []>} : vector<64x32xbf16>, vector<32x16xbf16>, vector<64x16xf32> -> vector<64x16xf32>
    %119 = arith.addf %115, %118 : vector<64x16xf32>
    %c0_85 = arith.constant 0 : index
    %c0_86 = arith.constant 0 : index
    %120 = vector.load %arg11[%c0_85, %c0_86] : memref<64x1xf32, #tpu.memory_space<vmem>>, vector<64x1xf32>
    %121 = vector.broadcast %120 : vector<64x1xf32> to vector<64x16xf32>
    %122 = arith.addf %119, %121 : vector<64x16xf32>
    %c0_87 = arith.constant 0 : index
    %c0_88 = arith.constant 0 : index
    %c0_89 = arith.constant 0 : index
    %123 = vector.load %arg12[%c0_87, %c0_88, %c0_89] : memref<1x64x16xf32, #tpu.memory_space<vmem>>, vector<1x64x16xf32>
    %124 = vector.shape_cast %123 : vector<1x64x16xf32> to vector<64x16xf32>
    %125 = vector.shape_cast %122 : vector<64x16xf32> to vector<1x64x16xf32>
    tpu.vector_store %arg12[%c0_87, %c0_88, %c0_89], %125 {strides = array<i32>} : memref<1x64x16xf32, #tpu.memory_space<vmem>>, vector<1x64x16xf32>,
    %cst_90 = arith.constant dense<0.000000e+00> : vector<64xf32>
    %126 = vector.multi_reduction <add>, %122, %cst_90 [1] : vector<64x16xf32> to vector<64xf32>
    %127 = vector.shape_cast %126 : vector<64xf32> to vector<64x1xf32>
    %128 = arith.mulf %122, %122 : vector<64x16xf32>
    %cst_91 = arith.constant dense<0.000000e+00> : vector<64xf32>
    %129 = vector.multi_reduction <add>, %128, %cst_91 [1] : vector<64x16xf32> to vector<64xf32>
    %130 = vector.shape_cast %129 : vector<64xf32> to vector<64x1xf32>
    %131 = tpu.concatenate %127, %130 in 1 : vector<64x1xf32>, vector<64x1xf32> -> vector<64x2xf32>
    %c0_92 = arith.constant 0 : index
    %c0_93 = arith.constant 0 : index
    %c0_94 = arith.constant 0 : index
    %c0_95 = arith.constant 0 : index
    %132 = vector.load %arg13[%c0_92, %c0_93, %c0_94, %c0_95] : memref<1x1x64x2xf32, #tpu.memory_space<vmem>>, vector<1x1x64x2xf32>
    %133 = vector.shape_cast %132 : vector<1x1x64x2xf32> to vector<64x2xf32>
    %134 = vector.shape_cast %131 : vector<64x2xf32> to vector<1x1x64x2xf32>
    tpu.vector_store %arg13[%c0_92, %c0_93, %c0_94, %c0_95], %134 {strides = array<i32>} : memref<1x1x64x2xf32, #tpu.memory_space<vmem>>, vector<1x1x64x2xf32>,
    return
  }
  func.func @transform_0(%arg0: i32, %arg1: i32) -> (i32, i32, i32) {
    %c0_i32 = arith.constant 0 : i32
    %c0_i32_0 = arith.constant 0 : i32
    return %arg0, %c0_i32, %arg1 : i32, i32, i32
  }
  func.func @transform_1(%arg0: i32, %arg1: i32) -> (i32, i32, i32, i32) {
    %c0_i32 = arith.constant 0 : i32
    %c0_i32_0 = arith.constant 0 : i32
    %c0_i32_1 = arith.constant 0 : i32
    %c0_i32_2 = arith.constant 0 : i32
    return %arg0, %c0_i32, %c0_i32_0, %c0_i32_1 : i32, i32, i32, i32
  }
  func.func @transform_2(%arg0: i32, %arg1: i32) -> (i32, i32, i32, i32) {
    %c0_i32 = arith.constant 0 : i32
    %c0_i32_0 = arith.constant 0 : i32
    %c0_i32_1 = arith.constant 0 : i32
    %c0_i32_2 = arith.constant 0 : i32
    return %arg0, %c0_i32, %c0_i32_0, %c0_i32_1 : i32, i32, i32, i32
  }
  func.func @transform_3(%arg0: i32, %arg1: i32) -> (i32, i32, i32) {
    %c0_i32 = arith.constant 0 : i32
    %c0_i32_0 = arith.constant 0 : i32
    %c0_i32_1 = arith.constant 0 : i32
    %c0_i32_2 = arith.constant 0 : i32
    return %c0_i32, %c0_i32_0, %c0_i32_1 : i32, i32, i32
  }
  func.func @transform_4(%arg0: i32, %arg1: i32) -> (i32, i32, i32) {
    %c0_i32 = arith.constant 0 : i32
    %c0_i32_0 = arith.constant 0 : i32
    %c0_i32_1 = arith.constant 0 : i32
    %c0_i32_2 = arith.constant 0 : i32
    return %c0_i32, %c0_i32_0, %c0_i32_1 : i32, i32, i32
  }
  func.func @transform_5(%arg0: i32, %arg1: i32) -> (i32, i32) {
    %c0_i32 = arith.constant 0 : i32
    %c0_i32_0 = arith.constant 0 : i32
    %c0_i32_1 = arith.constant 0 : i32
    return %c0_i32, %c0_i32_0 : i32, i32
  }
  func.func @transform_6(%arg0: i32, %arg1: i32) -> (i32, i32) {
    %c0_i32 = arith.constant 0 : i32
    %c0_i32_0 = arith.constant 0 : i32
    %c0_i32_1 = arith.constant 0 : i32
    return %c0_i32, %c0_i32_0 : i32, i32
  }
  func.func @transform_7(%arg0: i32, %arg1: i32) -> (i32, i32) {
    %c0_i32 = arith.constant 0 : i32
    %c0_i32_0 = arith.constant 0 : i32
    %c0_i32_1 = arith.constant 0 : i32
    return %c0_i32, %c0_i32_0 : i32, i32
  }
  func.func @transform_8(%arg0: i32, %arg1: i32) -> (i32, i32) {
    %c0_i32 = arith.constant 0 : i32
    %c0_i32_0 = arith.constant 0 : i32
    %c0_i32_1 = arith.constant 0 : i32
    return %c0_i32, %c0_i32_0 : i32, i32
  }
  func.func @transform_9(%arg0: i32, %arg1: i32) -> (i32, i32) {
    %c0_i32 = arith.constant 0 : i32
    %c0_i32_0 = arith.constant 0 : i32
    %c0_i32_1 = arith.constant 0 : i32
    return %c0_i32, %c0_i32_0 : i32, i32
  }
  func.func @transform_10(%arg0: i32, %arg1: i32) -> (i32, i32, i32) {
    %c0_i32 = arith.constant 0 : i32
    %c0_i32_0 = arith.constant 0 : i32
    return %arg0, %c0_i32, %arg1 : i32, i32, i32
  }
  func.func @transform_11(%arg0: i32, %arg1: i32) -> (i32, i32, i32, i32) {
    %c0_i32 = arith.constant 0 : i32
    %c0_i32_0 = arith.constant 0 : i32
    %c0_i32_1 = arith.constant 0 : i32
    return %arg0, %arg1, %c0_i32, %c0_i32_0 : i32, i32, i32, i32
  }
}

module attributes {stable_mosaic.version = 11 : i64} {
  func.func @_bn_mlp2_kernel(%arg0: i32, %arg1: i32, %arg2: memref<1x64x16xf32, #tpu.memory_space<vmem>>, %arg3: memref<1x32x16xf32, #tpu.memory_space<vmem>>, %arg4: memref<64x1xf32, #tpu.memory_space<vmem>>, %arg5: memref<64x1xf32, #tpu.memory_space<vmem>>, %arg6: memref<32x64xbf16, #tpu.memory_space<vmem>>, %arg7: memref<32x1xf32, #tpu.memory_space<vmem>>, %arg8: memref<1x32x16xf32, #tpu.memory_space<vmem>>) attributes {dimension_semantics = [#tpu.dimension_semantics<parallel>, #tpu.dimension_semantics<parallel>], iteration_bounds = array<i64: 2, 1>, scalar_prefetch = 0 : i64, scratch_operands = 0 : i64, tpu.core_type = #tpu.core_type<tc>, window_params = [{transform_indices = @transform_0, window_bounds = array<i64: 1, 64, 16>}, {transform_indices = @transform_1, window_bounds = array<i64: 1, 32, 16>}, {pipeline_mode = #tpu.pipeline_mode<synchronous>, transform_indices = @transform_2, window_bounds = array<i64: 64, 1>}, {pipeline_mode = #tpu.pipeline_mode<synchronous>, transform_indices = @transform_3, window_bounds = array<i64: 64, 1>}, {pipeline_mode = #tpu.pipeline_mode<synchronous>, transform_indices = @transform_4, window_bounds = array<i64: 32, 64>}, {pipeline_mode = #tpu.pipeline_mode<synchronous>, transform_indices = @transform_5, window_bounds = array<i64: 32, 1>}, {transform_indices = @transform_6, window_bounds = array<i64: 1, 32, 16>}]} {
    %c0 = arith.constant 0 : index
    %c0_0 = arith.constant 0 : index
    %c0_1 = arith.constant 0 : index
    %0 = vector.load %arg2[%c0, %c0_0, %c0_1] : memref<1x64x16xf32, #tpu.memory_space<vmem>>, vector<1x64x16xf32>
    %1 = vector.shape_cast %0 : vector<1x64x16xf32> to vector<64x16xf32>
    %c0_2 = arith.constant 0 : index
    %c0_3 = arith.constant 0 : index
    %2 = vector.load %arg4[%c0_2, %c0_3] : memref<64x1xf32, #tpu.memory_space<vmem>>, vector<64x1xf32>
    %3 = vector.broadcast %2 : vector<64x1xf32> to vector<64x16xf32>
    %4 = arith.mulf %1, %3 : vector<64x16xf32>
    %c0_4 = arith.constant 0 : index
    %c0_5 = arith.constant 0 : index
    %5 = vector.load %arg5[%c0_4, %c0_5] : memref<64x1xf32, #tpu.memory_space<vmem>>, vector<64x1xf32>
    %6 = vector.broadcast %5 : vector<64x1xf32> to vector<64x16xf32>
    %7 = arith.addf %4, %6 : vector<64x16xf32>
    %cst = arith.constant 0.000000e+00 : f32
    %8 = vector.broadcast %cst : f32 to vector<64x16xf32>
    %9 = arith.maximumf %7, %8 : vector<64x16xf32>
    %c0_6 = arith.constant 0 : index
    %c0_7 = arith.constant 0 : index
    %10 = vector.load %arg6[%c0_6, %c0_7] : memref<32x64xbf16, #tpu.memory_space<vmem>>, vector<32x64xbf16>
    %11 = arith.truncf %9 : vector<64x16xf32> to vector<64x16xbf16>
    %cst_8 = arith.constant dense<0.000000e+00> : vector<32x16xf32>
    %12 = tpu.matmul %10, %11, %cst_8 {dimension_numbers = #tpu.dot_dimension_numbers<[1], [0], [0], [1], [0, 0, 1, 1], [], []>} : vector<32x64xbf16>, vector<64x16xbf16>, vector<32x16xf32> -> vector<32x16xf32>
    %c0_9 = arith.constant 0 : index
    %c0_10 = arith.constant 0 : index
    %c0_11 = arith.constant 0 : index
    %13 = vector.load %arg3[%c0_9, %c0_10, %c0_11] : memref<1x32x16xf32, #tpu.memory_space<vmem>>, vector<1x32x16xf32>
    %14 = vector.shape_cast %13 : vector<1x32x16xf32> to vector<32x16xf32>
    %15 = arith.addf %14, %12 : vector<32x16xf32>
    %c0_12 = arith.constant 0 : index
    %c0_13 = arith.constant 0 : index
    %16 = vector.load %arg7[%c0_12, %c0_13] : memref<32x1xf32, #tpu.memory_space<vmem>>, vector<32x1xf32>
    %17 = vector.broadcast %16 : vector<32x1xf32> to vector<32x16xf32>
    %18 = arith.addf %15, %17 : vector<32x16xf32>
    %c0_14 = arith.constant 0 : index
    %c0_15 = arith.constant 0 : index
    %c0_16 = arith.constant 0 : index
    %19 = vector.load %arg8[%c0_14, %c0_15, %c0_16] : memref<1x32x16xf32, #tpu.memory_space<vmem>>, vector<1x32x16xf32>
    %20 = vector.shape_cast %19 : vector<1x32x16xf32> to vector<32x16xf32>
    %21 = vector.shape_cast %18 : vector<32x16xf32> to vector<1x32x16xf32>
    tpu.vector_store %arg8[%c0_14, %c0_15, %c0_16], %21 {strides = array<i32>} : memref<1x32x16xf32, #tpu.memory_space<vmem>>, vector<1x32x16xf32>,
    return
  }
  func.func @transform_0(%arg0: i32, %arg1: i32) -> (i32, i32, i32) {
    %c0_i32 = arith.constant 0 : i32
    %c0_i32_0 = arith.constant 0 : i32
    return %arg0, %c0_i32, %arg1 : i32, i32, i32
  }
  func.func @transform_1(%arg0: i32, %arg1: i32) -> (i32, i32, i32) {
    %c0_i32 = arith.constant 0 : i32
    %c0_i32_0 = arith.constant 0 : i32
    return %arg0, %c0_i32, %arg1 : i32, i32, i32
  }
  func.func @transform_2(%arg0: i32, %arg1: i32) -> (i32, i32) {
    %c0_i32 = arith.constant 0 : i32
    %c0_i32_0 = arith.constant 0 : i32
    %c0_i32_1 = arith.constant 0 : i32
    return %c0_i32, %c0_i32_0 : i32, i32
  }
  func.func @transform_3(%arg0: i32, %arg1: i32) -> (i32, i32) {
    %c0_i32 = arith.constant 0 : i32
    %c0_i32_0 = arith.constant 0 : i32
    %c0_i32_1 = arith.constant 0 : i32
    return %c0_i32, %c0_i32_0 : i32, i32
  }
  func.func @transform_4(%arg0: i32, %arg1: i32) -> (i32, i32) {
    %c0_i32 = arith.constant 0 : i32
    %c0_i32_0 = arith.constant 0 : i32
    %c0_i32_1 = arith.constant 0 : i32
    return %c0_i32, %c0_i32_0 : i32, i32
  }
  func.func @transform_5(%arg0: i32, %arg1: i32) -> (i32, i32) {
    %c0_i32 = arith.constant 0 : i32
    %c0_i32_0 = arith.constant 0 : i32
    %c0_i32_1 = arith.constant 0 : i32
    return %c0_i32, %c0_i32_0 : i32, i32
  }
  func.func @transform_6(%arg0: i32, %arg1: i32) -> (i32, i32, i32) {
    %c0_i32 = arith.constant 0 : i32
    %c0_i32_0 = arith.constant 0 : i32
    return %arg0, %c0_i32, %arg1 : i32, i32, i32
  }
}

</mosaic_0001>

<bundles_post_ra>
// kernel: self_attentional_layer_pallas.6
= control target key start
LH: loop header
LB: loop body
LE: loop exit
PB: predicated region body
PF: predicated region fallthrough
CT: control target
= control target key end

     0   :  { %s1098_s21 = smov 0   ;;  %s1100_s22 = smov 0   ;;  %s1246_s0 = inlined_call_operand.vmem [shape: f32[2,32,16], index: 0, kind: input, shape index: {}]   ;;  %s1247_s1 = inlined_call_operand.vmem [shape: bf16[4,8,32], index: 1, kind: input, shape index: {}]   ;;  %s1248_s2 = inlined_call_operand.vmem [shape: f32[4,8,1], index: 2, kind: input, shape index: {}]   ;;  %s1249_s3 = inlined_call_operand.vmem [shape: bf16[4,8,32], index: 3, kind: input, shape index: {}]   ;;  %s1250_s4 = inlined_call_operand.vmem [shape: f32[4,8,1], index: 4, kind: input, shape index: {}]   ;;  %s1251_s5 = inlined_call_operand.vmem [shape: bf16[2,4,8,16], index: 5, kind: output, shape index: {0}]   ;;  %s1252_s6 = inlined_call_operand.vmem [shape: bf16[2,4,8,16], index: 6, kind: output, shape index: {1}]  }
   0x1   :  { %s1102_s23 = smov 0  }
   0x2 LB: > { %s29_s24 = sadd.s32 1, %s1054_s22  ;;  %p881_p0 = scmp.ge.s32.totalorder %s1058_s23, 1  ;;  %s1058_s23 = sphi %s1102_s23, %s17_s23   ;;  %s1054_s22 = sphi %s1100_s22, %s1254_s22   ;;  %s1050_s21 = sphi %s1098_s21, %s1253_s21  }
   0x3   : > { %p31_p1 = scmp.ge.s32.totalorder %s29_s24, 2  ;;  %p236_p2 = scmp.lt.s32.totalorder %s1058_s23, 3 }
   0x5   : > { %s1256_s24 = smov (%p31_p1, %s29_s24), 0  ;;  %p237_p3 = pnand %p881_p0, %p236_p2 }
   0x6   : > { %p280_p4 = scmp.lt.s32.totalorder (!%p237_p3), %s1050_s21, 1 }
   0x7   : > { %240 = sbr.rel (%p237_p3) target bundleno = 248 (0xf8), region = 40 }
   0xc   : > { %v1060_v0 = vmov 0.0   ;;  %s1258_s21 = smov (!%p280_p4, %s1050_s21), 1  ;;  %vm1061_vm0 = vmmov 0   ;;  %v1062_v1 = vmov 0   ;;  %v312_v2 = vld [vmem:[%s1248_s2] sm:$0xff]  ;;  %v891_v3 = vld [vmem:[%s1248_s2 + $0x8] sm:$0xff] }
   0xd   : > { %943 = vmatprep.subr.bf16.mxu0 %v1060_v0  ;;  %951 = vmatprep.subr.bf16.mxu1 %v1060_v0  ;;  %s916_s27 = sshll.u32 %s1258_s21, 5  ;;  %v363_v4 = vld [vmem:[%s1250_s4] sm:$0xff]  ;;  %v894_v10 = vld [vmem:[%s1250_s4 + $0x8] sm:$0xff]  ;;  %v899_v12 = vld [vmem:[%s1248_s2 + $0x10] sm:$0xff]  ;;  %vm318_vm1 = vcmask 261120   ;;  %s917_s17 = sshll.u32 %s1258_s21, 4 }
   0xe   : > { %947 = vmatprep.mubr.msk.bf16.mxu0 %vm1061_vm0, %v1060_v0  ;;  %955 = vmatprep.mubr.msk.bf16.mxu1 %vm1061_vm0, %v1060_v0  ;;  %s287_s8 = scalar_lea.vmem %s1246_s0, %s916_s27  ;;  %v902_v13 = vld [vmem:[%s1250_s4 + $0x10] sm:$0xff]  ;;  %v311_v14 = vld [vmem:[%s1247_s1] sm:$0xf]  ;;  %v910_v16 = vld [vmem:[%s1250_s4 + $0x18] sm:$0xff]  ;;  %s1214_s20 = scalar_lea.vmem %s1251_s5, %s917_s17  ;;  %vm413_vm2 = vcmask 125952  }
   0xf   : > { %1034 = vset.pattern.permute.xlu0 %v1062_v1  ;;  %1035 = vset.pattern.permute.xlu1 %v1062_v1  ;;  %v307_v5 = vld [vmem:[%s287_s8 + $0x10] sm:$0xff]  ;;  %v308_v6 = vld [vmem:[%s287_s8 + $0x18] sm:$0xff]  ;;  %v305_v7 = vld [vmem:[%s287_s8] sm:$0xff]  ;;  %s1219_s27 = scalar_lea.vmem %s1252_s6, %s917_s17 }
  0x10   : > { %315 = vperm.xlu0 %1034, %v312_v2   ;;  %423 = vperm.xlu1 %1035, %v891_v3   ;;  %v310_v8 = vpack.c.bf16 %v308_v6, %v307_v5  ;;  %v306_v9 = vld [vmem:[%s287_s8 + $0x8] sm:$0xff]  ;;  %v362_v15 = vld [vmem:[%s1249_s3] sm:$0xf]  ;;  %v907_v17 = vld [vmem:[%s1248_s2 + $0x18] sm:$0xff] }
  0x11   : > { %v309_v11 = vpack.c.bf16 %v306_v9, %v305_v7  ;;  %v890_v18 = vld [vmem:[%s1247_s1 + $0x4] sm:$0xf]  ;;  %v898_v20 = vld [vmem:[%s1247_s1 + $0x8] sm:$0xf]  ;;  %v906_v22 = vld [vmem:[%s1247_s1 + $0xc] sm:$0xf] }
  0x12   : > { %944 = vmatpush3.bf16.msra.mxu0 %v310_v8  ;;  %952 = vmatpush3.bf16.msra.mxu1 %v310_v8  ;;  %v893_v19 = vld [vmem:[%s1249_s3 + $0x4] sm:$0xf]  ;;  %v901_v21 = vld [vmem:[%s1249_s3 + $0x8] sm:$0xf]  ;;  %v909_v23 = vld [vmem:[%s1249_s3 + $0xc] sm:$0xf] }
  0x13   : > { %945 = vmatprep.subr.bf16.mxu0 %v1060_v0  ;;  %953 = vmatprep.subr.bf16.mxu1 %v1060_v0 }
  0x14   : > { %366 = vperm.xlu0 %1034, %v363_v4   ;;  %475 = vperm.xlu1 %1035, %v894_v10  }
  0x16   : > { %946 = vmatpush3.bf16.msra.mxu0 %v309_v11  ;;  %954 = vmatpush3.bf16.msra.mxu1 %v309_v11 }
  0x17   : > { %959 = vmatprep.subr.bf16.mxu0 %v1060_v0  ;;  %967 = vmatprep.subr.bf16.mxu1 %v1060_v0 }
  0x18   : > { %533 = vperm.xlu0 %1034, %v899_v12   ;;  %585 = vperm.xlu1 %1035, %v902_v13  }
  0x19   : > { %948 = vmatmul.mubr.msk.bf16.vlgmr.msra.gmra.mxu0 %vm318_vm1, %v311_v14  ;;  %956 = vmatmul.mubr.msk.bf16.vlgmr.msra.gmra.mxu1 %vm318_vm1, %v362_v15 }
  0x1a   : > { %960 = vmatpush3.bf16.msra.mxu0 %v310_v8  ;;  %968 = vmatpush3.bf16.msra.mxu1 %v310_v8 }
  0x1b   : > { %961 = vmatprep.subr.bf16.mxu0 %v1060_v0  ;;  %969 = vmatprep.subr.bf16.mxu1 %v1060_v0 }
  0x1c   : > { %963 = vmatprep.mubr.msk.bf16.mxu0 %vm1061_vm0, %v1060_v0  ;;  %971 = vmatprep.mubr.msk.bf16.mxu1 %vm1061_vm0, %v1060_v0 }
  0x1d   : > { %695 = vperm.xlu1 %1035, %v910_v16   ;;  %643 = vperm.xlu0 %1034, %v907_v17  }
  0x1e   : > { %962 = vmatpush3.bf16.msra.mxu0 %v309_v11  ;;  %970 = vmatpush3.bf16.msra.mxu1 %v309_v11 }
  0x1f   : > { %975 = vmatprep.subr.bf16.mxu0 %v1060_v0  ;;  %983 = vmatprep.subr.bf16.mxu1 %v1060_v0 }
  0x21   : > { %964 = vmatmul.mubr.msk.bf16.vlgmr.msra.gmra.mxu0 %vm318_vm1, %v890_v18  ;;  %972 = vmatmul.mubr.msk.bf16.vlgmr.msra.gmra.mxu1 %vm318_vm1, %v893_v19 }
  0x22   : > { %976 = vmatpush3.bf16.msra.mxu0 %v310_v8  ;;  %984 = vmatpush3.bf16.msra.mxu1 %v310_v8 }
  0x23   : > { %977 = vmatprep.subr.bf16.mxu0 %v1060_v0  ;;  %985 = vmatprep.subr.bf16.mxu1 %v1060_v0 }
  0x24   : > { %979 = vmatprep.mubr.msk.bf16.mxu0 %vm1061_vm0, %v1060_v0  ;;  %987 = vmatprep.mubr.msk.bf16.mxu1 %vm1061_vm0, %v1060_v0 }
  0x26   : > { %978 = vmatpush3.bf16.msra.mxu0 %v309_v11  ;;  %986 = vmatpush3.bf16.msra.mxu1 %v309_v11 }
  0x27   : > { %991 = vmatprep.subr.bf16.mxu0 %v1060_v0  ;;  %999 = vmatprep.subr.bf16.mxu1 %v1060_v0 }
  0x29   : > { %980 = vmatmul.mubr.msk.bf16.vlgmr.msra.gmra.mxu0 %vm318_vm1, %v898_v20  ;;  %988 = vmatmul.mubr.msk.bf16.vlgmr.msra.gmra.mxu1 %vm318_vm1, %v901_v21 }
  0x2a   : > { %992 = vmatpush3.bf16.msra.mxu0 %v310_v8  ;;  %1000 = vmatpush3.bf16.msra.mxu1 %v310_v8 }
  0x2b   : > { %993 = vmatprep.subr.bf16.mxu0 %v1060_v0  ;;  %1001 = vmatprep.subr.bf16.mxu1 %v1060_v0 }
  0x2c   : > { %995 = vmatprep.mubr.msk.bf16.mxu0 %vm1061_vm0, %v1060_v0  ;;  %1003 = vmatprep.mubr.msk.bf16.mxu1 %vm1061_vm0, %v1060_v0 }
  0x2e   : > { %994 = vmatpush3.bf16.msra.mxu0 %v309_v11  ;;  %1002 = vmatpush3.bf16.msra.mxu1 %v309_v11 }
  0x31   : > { %996 = vmatmul.mubr.msk.bf16.vlgmr.msra.gmra.mxu0 %vm318_vm1, %v906_v22  ;;  %1004 = vmatmul.mubr.msk.bf16.vlgmr.msra.gmra.mxu1 %vm318_vm1, %v909_v23 }
  0x8b   : > { %v316_v24 = vpop.permute.xlu0 %315  ;;  %v424_v30 = vpop.permute.xlu1 %423 }
  0x8f   : > { %v367_v25 = vpop.permute.xlu0 %366  ;;  %v476_v39 = vpop.permute.xlu1 %475 }
  0x93   : > { %v586_v52 = vpop.permute.xlu1 %585  ;;  %v534_v53 = vpop.permute.xlu0 %533 }
  0x98   : > { %v696_v2 = vpop.permute.xlu1 %695  ;;  %v644_v3 = vpop.permute.xlu0 %643 }
  0xd9   : > { %v356_v26 = vpop.f32.mrf.mxu0  ;;  %v406_v27 = vpop.f32.mrf.mxu1 }
  0xda   : > { %v357_v28 = vadd.f32 %v356_v26, %v316_v24  ;;  %v407_v29 = vadd.f32 %v406_v27, %v367_v25 }
  0xdb   : > { %v949_v31 = vpop.f32.mrf.mxu0  ;;  %v957_v32 = vpop.f32.mrf.mxu1 }
  0xdc   : > { %v412_v33 = vpack.c.bf16 %v357_v28, %v357_v28  ;;  %v415_v34 = vpack.c.bf16 %v407_v29, %v407_v29 }
  0xdd   : > { %v359_v35 = vpop.f32.mrf.mxu0  ;;  %v409_v36 = vpop.f32.mrf.mxu1 }
  0xde   : > { %414 = vst.msk [vmem:[%s1214_s20] sm:$0xf] %vm413_vm2, %v412_v33  ;;  %416 = vst.msk [vmem:[%s1219_s27] sm:$0xf] %vm413_vm2, %v415_v34 }
  0xdf   : > { %v950_v37 = vpop.f32.mrf.mxu0  ;;  %v958_v38 = vpop.f32.mrf.mxu1 }
  0xe1   : > { %v463_v40 = vpop.f32.mrf.mxu0  ;;  %v515_v41 = vpop.f32.mrf.mxu1 }
  0xe2   : > { %v464_v42 = vadd.f32 %v463_v40, %v424_v30  ;;  %v516_v43 = vadd.f32 %v515_v41, %v476_v39 }
  0xe3   : > { %v965_v44 = vpop.f32.mrf.mxu0  ;;  %v973_v45 = vpop.f32.mrf.mxu1 }
  0xe4   : > { %v521_v46 = vpack.c.bf16 %v464_v42, %v464_v42  ;;  %v524_v47 = vpack.c.bf16 %v516_v43, %v516_v43 }
  0xe5   : > { %v466_v48 = vpop.f32.mrf.mxu0  ;;  %v518_v49 = vpop.f32.mrf.mxu1 }
  0xe6   : > { %896 = vst.msk [vmem:[%s1214_s20 + $0x4] sm:$0xf] %vm413_vm2, %v521_v46  ;;  %897 = vst.msk [vmem:[%s1219_s27 + $0x4] sm:$0xf] %vm413_vm2, %v524_v47 }
  0xe7   : > { %v966_v50 = vpop.f32.mrf.mxu0  ;;  %v974_v51 = vpop.f32.mrf.mxu1 }
  0xe9   : > { %v573_v54 = vpop.f32.mrf.mxu0  ;;  %v625_v55 = vpop.f32.mrf.mxu1 }
  0xea   : > { %v574_v56 = vadd.f32 %v573_v54, %v534_v53  ;;  %v626_v57 = vadd.f32 %v625_v55, %v586_v52 }
  0xeb   : > { %v981_v58 = vpop.f32.mrf.mxu0  ;;  %v989_v59 = vpop.f32.mrf.mxu1 }
  0xec   : > { %v631_v60 = vpack.c.bf16 %v574_v56, %v574_v56  ;;  %v634_v61 = vpack.c.bf16 %v626_v57, %v626_v57 }
  0xed   : > { %v576_v62 = vpop.f32.mrf.mxu0  ;;  %v628_v63 = vpop.f32.mrf.mxu1 }
  0xee   : > { %904 = vst.msk [vmem:[%s1214_s20 + $0x8] sm:$0xf] %vm413_vm2, %v631_v60  ;;  %905 = vst.msk [vmem:[%s1219_s27 + $0x8] sm:$0xf] %vm413_vm2, %v634_v61 }
  0xef   : > { %v982_v0 = vpop.f32.mrf.mxu0  ;;  %v990_v1 = vpop.f32.mrf.mxu1 }
  0xf1   : > { %v683_v4 = vpop.f32.mrf.mxu0  ;;  %v735_v5 = vpop.f32.mrf.mxu1 }
  0xf2   : > { %v684_v6 = vadd.f32 %v683_v4, %v644_v3  ;;  %v736_v7 = vadd.f32 %v735_v5, %v696_v2 }
  0xf3   : > { %v997_v8 = vpop.f32.mrf.mxu0  ;;  %v1005_v9 = vpop.f32.mrf.mxu1 }
  0xf4   : > { %v741_v10 = vpack.c.bf16 %v684_v6, %v684_v6  ;;  %v744_v11 = vpack.c.bf16 %v736_v7, %v736_v7 }
  0xf5   : > { %v686_v12 = vpop.f32.mrf.mxu0  ;;  %v738_v13 = vpop.f32.mrf.mxu1 }
  0xf6   : > { %912 = vst.msk [vmem:[%s1214_s20 + $0xc] sm:$0xf] %vm413_vm2, %v741_v10  ;;  %913 = vst.msk [vmem:[%s1219_s27 + $0xc] sm:$0xf] %vm413_vm2, %v744_v11 }
  0xf7   : > { %v998_v14 = vpop.f32.mrf.mxu0  ;;  %v1006_v15 = vpop.f32.mrf.mxu1 }
  0xf8 PF: > { %s17_s23 = sadd.s32 1, %s1058_s23   ;;  %s1253_s21 = smov %s1054_s22 }
  0xf9   : > { %p14_p5 = scmp.ge.s32.totalorder %s17_s23, 4   ;;  %s1254_s22 = smov %s1256_s24 }
  0xfb   :  { %16 = sbr.rel (!%p14_p5) target bundleno = 2 (0x2), region = 100 }

// kernel: self_attentional_layer_pallas.8
= control target key start
LH: loop header
LB: loop body
LE: loop exit
PB: predicated region body
PF: predicated region fallthrough
CT: control target
= control target key end

     0   :  { %s786_s21 = smov 0   ;;  %s788_s22 = smov 0   ;;  %s912_s0 = inlined_call_operand.vmem [shape: f32[2,64,16], index: 0, kind: input, shape index: {}]   ;;  %s913_s1 = inlined_call_operand.vmem [shape: f32[2,32,16], index: 1, kind: input, shape index: {}]   ;;  %s914_s2 = inlined_call_operand.vmem [shape: f32[64,1], index: 2, kind: input, shape index: {}]   ;;  %s915_s3 = inlined_call_operand.vmem [shape: f32[64,1], index: 3, kind: input, shape index: {}]   ;;  %s916_s4 = inlined_call_operand.vmem [shape: bf16[32,64], index: 4, kind: input, shape index: {}]   ;;  %s917_s5 = inlined_call_operand.vmem [shape: f32[32,1], index: 5, kind: input, shape index: {}]   ;;  %s918_s6 = inlined_call_operand.vmem [shape: f32[2,32,16], index: 6, kind: output, shape index: {}]  }
   0x1   :  { %s790_s23 = smov 0  }
   0x2 LB: > { %s28_s24 = sadd.s32 1, %s744_s22  ;;  %p663_p0 = scmp.ge.s32.totalorder %s748_s23, 1  ;;  %s748_s23 = sphi %s790_s23, %s16_s23   ;;  %s744_s22 = sphi %s788_s22, %s920_s22   ;;  %s740_s21 = sphi %s786_s21, %s919_s21  }
   0x3   : > { %p30_p1 = scmp.ge.s32.totalorder %s28_s24, 2  ;;  %p246_p2 = scmp.lt.s32.totalorder %s748_s23, 3 }
   0x5   : > { %s922_s24 = smov (%p30_p1, %s28_s24), 0  ;;  %p247_p3 = pnand %p663_p0, %p246_p2 }
   0x6   : > { %p290_p4 = scmp.lt.s32.totalorder (!%p247_p3), %s740_s21, 1 }
   0x7   : > { %250 = sbr.rel (%p247_p3) target bundleno = 380 (0x17c), region = 44 }
   0xc   : > { %v385_v0 = vld [vmem:[%s915_s3 + $0x30] sm:$0xff]  ;;  %v750_v2 = vmov 0   ;;  %v386_v3 = vld [vmem:[%s915_s3 + $0x38] sm:$0xff]  ;;  %v328_v5 = vld [vmem:[%s914_s2 + $0x28] sm:$0xff]  ;;  %vm461_vm0 = vcmask 523264   ;;  %s924_s21 = smov (!%p290_p4, %s740_s21), 1 }
   0xd   : > { %v329_v1 = vld [vmem:[%s914_s2 + $0x30] sm:$0xff]  ;;  %723 = vset.pattern.permute.xlu1 %v750_v2  ;;  %722 = vset.pattern.permute.xlu0 %v750_v2  ;;  %v330_v4 = vld [vmem:[%s914_s2 + $0x38] sm:$0xff]  ;;  %v327_v6 = vld [vmem:[%s914_s2 + $0x20] sm:$0xff]  ;;  %s676_s27 = sshll.u32 %s924_s21, 6  ;;  %s677_s9 = sshll.u32 %s924_s21, 5  ;;  %vm553_vm1 = vcmask 130048  }
   0xe   : > { %419 = vperm.xlu1 %723, %v385_v0   ;;  %363 = vperm.xlu0 %722, %v329_v1   ;;  %v384_v7 = vld [vmem:[%s915_s3 + $0x28] sm:$0xff]  ;;  %v383_v8 = vld [vmem:[%s915_s3 + $0x20] sm:$0xff]  ;;  %v326_v9 = vld [vmem:[%s914_s2 + $0x18] sm:$0xff]  ;;  %s878_s30 = scalar_lea.vmem %s912_s0, %s676_s27  ;;  %s305_s12 = scalar_lea.vmem %s913_s1, %s677_s9 }
   0xf   : > { %v325_v10 = vld [vmem:[%s914_s2 + $0x10] sm:$0xff]  ;;  %v382_v11 = vld [vmem:[%s915_s3 + $0x18] sm:$0xff]  ;;  %v324_v13 = vld [vmem:[%s914_s2 + $0x8] sm:$0xff]  ;;  %s313_s15 = scalar_lea.vmem %s918_s6, %s677_s9 }
  0x10   : > { %v381_v12 = vld [vmem:[%s915_s3 + $0x10] sm:$0xff]  ;;  %v323_v14 = vld [vmem:[%s914_s2] sm:$0xff]  ;;  %v380_v15 = vld [vmem:[%s915_s3 + $0x8] sm:$0xff] }
  0x11   : > { %v379_v16 = vld [vmem:[%s915_s3] sm:$0xff]  ;;  %v526_v17 = vld [vmem:[%s917_s5 + $0x8] sm:$0xff]  ;;  %v528_v20 = vld [vmem:[%s917_s5 + $0x18] sm:$0xff] }
  0x12   : > { %424 = vperm.xlu1 %723, %v386_v3   ;;  %368 = vperm.xlu0 %722, %v330_v4   ;;  %v525_v18 = vld [vmem:[%s917_s5] sm:$0xff]  ;;  %v527_v21 = vld [vmem:[%s917_s5 + $0x10] sm:$0xff]  ;;  %v322_v26 = vld [vmem:[%s878_s30 + $0x38] sm:$0xff] }
  0x13   : > { %v724_v19 = vld [vmem:[%s916_s4] sm:$0xff]   ;;  %v321_v22 = vld [vmem:[%s878_s30 + $0x30] sm:$0xff]  ;;  %v320_v33 = vld [vmem:[%s878_s30 + $0x28] sm:$0xff] }
  0x14   : > { %693 = vmatprep.mubr.msk.bf16.mxu0 %vm461_vm0, %v724_v19  ;;  %v319_v35 = vld [vmem:[%s878_s30 + $0x20] sm:$0xff]  ;;  %v318_v48 = vld [vmem:[%s878_s30 + $0x18] sm:$0xff]  ;;  %v317_v50 = vld [vmem:[%s878_s30 + $0x10] sm:$0xff] }
  0x15   : > { %v316_v61 = vld [vmem:[%s878_s30 + $0x8] sm:$0xff]  ;;  %v315_v63 = vld [vmem:[%s878_s30] sm:$0xff]  ;;  %v520_v19 = vld [vmem:[%s305_s12 + $0x18] sm:$0xff] }
  0x16   : > { %358 = vperm.xlu1 %723, %v328_v5   ;;  %353 = vperm.xlu0 %722, %v327_v6  }
  0x1a   : > { %414 = vperm.xlu1 %723, %v384_v7   ;;  %409 = vperm.xlu0 %722, %v383_v8  }
  0x1e   : > { %348 = vperm.xlu1 %723, %v326_v9   ;;  %343 = vperm.xlu0 %722, %v325_v10   ;;  %v725_v10 = vld [vmem:[%s916_s4 + $0x8] sm:$0xff]  }
  0x22   : > { %404 = vperm.xlu1 %723, %v382_v11   ;;  %399 = vperm.xlu0 %722, %v381_v12   ;;  %v519_v12 = vld [vmem:[%s305_s12 + $0x10] sm:$0xff] }
  0x26   : > { %338 = vperm.xlu1 %723, %v324_v13   ;;  %333 = vperm.xlu0 %722, %v323_v14  }
  0x2a   : > { %394 = vperm.xlu1 %723, %v380_v15   ;;  %389 = vperm.xlu0 %722, %v379_v16   ;;  %v517_v15 = vld [vmem:[%s305_s12] sm:$0xff] }
  0x2e   : > { %536 = vperm.xlu1 %723, %v526_v17   ;;  %531 = vperm.xlu0 %722, %v525_v18  }
  0x32   : > { %546 = vperm.xlu1 %723, %v528_v20   ;;  %541 = vperm.xlu0 %722, %v527_v21  }
  0x89   : > { %v420_v23 = vpop.permute.xlu1 %419  ;;  %v364_v24 = vpop.permute.xlu0 %363 }
  0x8a   : > { %v377_v25 = vmul.f32 %v364_v24, %v321_v22 }
  0x8c   : > { %v433_v29 = vadd.f32 %v420_v23, %v377_v25  ;;  %v518_v23 = vld [vmem:[%s305_s12 + $0x8] sm:$0xff] }
  0x8d   : > { %v425_v27 = vpop.permute.xlu1 %424  ;;  %v369_v28 = vpop.permute.xlu0 %368 }
  0x8e   : > { %v378_v30 = vmul.f32 %v369_v28, %v322_v26  ;;  %v441_v36 = vmax.f32 %v433_v29, 0.0 }
  0x90   : > { %v434_v31 = vadd.f32 %v425_v27, %v378_v30 }
  0x91   : > { %v359_v32 = vpop.permute.xlu1 %358  ;;  %v354_v34 = vpop.permute.xlu0 %353 }
  0x92   : > { %v442_v37 = vmax.f32 %v434_v31, 0.0  ;;  %v376_v38 = vmul.f32 %v359_v32, %v320_v33  ;;  %v375_v39 = vmul.f32 %v354_v34, %v319_v35 }
  0x94   : > { %v450_v40 = vpack.c.bf16 %v442_v37, %v441_v36 }
  0x95   : > { %v415_v41 = vpop.permute.xlu1 %414  ;;  %v410_v42 = vpop.permute.xlu0 %409 }
  0x96   : > { %v432_v43 = vadd.f32 %v415_v41, %v376_v38  ;;  %v431_v44 = vadd.f32 %v410_v42, %v375_v39  ;;  %685 = vmatprep.subr.bf16.mxu0 %v450_v40 }
  0x97   : > { %686 = vmatpush3.bf16.msra.mxu0 %v450_v40 }
  0x98   : > { %v440_v45 = vmax.f32 %v432_v43, 0.0  ;;  %v439_v46 = vmax.f32 %v431_v44, 0.0 }
  0x99   : > { %v349_v47 = vpop.permute.xlu1 %348  ;;  %v344_v49 = vpop.permute.xlu0 %343 }
  0x9a   : > { %v449_v51 = vpack.c.bf16 %v440_v45, %v439_v46  ;;  %v374_v52 = vmul.f32 %v349_v47, %v318_v48  ;;  %v373_v53 = vmul.f32 %v344_v49, %v317_v50 }
  0x9c   : > { %687 = vmatprep.subr.bf16.mxu0 %v449_v51 }
  0x9d   : > { %v405_v54 = vpop.permute.xlu1 %404  ;;  %v400_v55 = vpop.permute.xlu0 %399  ;;  %688 = vmatpush3.bf16.msra.mxu0 %v449_v51 }
  0x9e   : > { %v430_v56 = vadd.f32 %v405_v54, %v374_v52  ;;  %v429_v57 = vadd.f32 %v400_v55, %v373_v53 }
  0xa0   : > { %v438_v58 = vmax.f32 %v430_v56, 0.0  ;;  %v437_v59 = vmax.f32 %v429_v57, 0.0 }
  0xa1   : > { %v339_v60 = vpop.permute.xlu1 %338  ;;  %v334_v62 = vpop.permute.xlu0 %333 }
  0xa2   : > { %v448_v0 = vpack.c.bf16 %v438_v58, %v437_v59  ;;  %v372_v1 = vmul.f32 %v339_v60, %v316_v61  ;;  %v371_v2 = vmul.f32 %v334_v62, %v315_v63 }
  0xa4   : > { %689 = vmatprep.subr.bf16.mxu0 %v448_v0 }
  0xa5   : > { %v395_v3 = vpop.permute.xlu1 %394  ;;  %v390_v4 = vpop.permute.xlu0 %389  ;;  %690 = vmatpush3.bf16.msra.mxu0 %v448_v0 }
  0xa6   : > { %v428_v5 = vadd.f32 %v395_v3, %v372_v1  ;;  %v427_v6 = vadd.f32 %v390_v4, %v371_v2 }
  0xa8   : > { %v436_v7 = vmax.f32 %v428_v5, 0.0  ;;  %v435_v8 = vmax.f32 %v427_v6, 0.0 }
  0xa9   : > { %v532_v11 = vpop.permute.xlu0 %531  ;;  %v537_v13 = vpop.permute.xlu1 %536 }
  0xaa   : > { %v447_v9 = vpack.c.bf16 %v436_v7, %v435_v8 }
  0xac   : > { %691 = vmatprep.subr.bf16.mxu0 %v447_v9 }
  0xad   : > { %692 = vmatpush3.bf16.msra.mxu0 %v447_v9  ;;  %v542_v17 = vpop.permute.xlu0 %541  ;;  %v547_v26 = vpop.permute.xlu1 %546 }
  0xb0   : > { %694 = vmatmul.mubr.msk.bf16.vlgmr.msra.gmra.mxu0 %vm461_vm0, %v725_v10 }
 0x170   : > { %v695_v14 = vpop.f32.mrf.mxu0 }
 0x171   : > { %v523_v16 = vadd.f32 %v695_v14, %v519_v12 }
 0x172   : > { %v502_v18 = vpop.f32.mrf.mxu0 }
 0x173   : > { %v551_v20 = vadd.f32 %v542_v17, %v523_v16  ;;  %v521_v21 = vadd.f32 %v517_v15, %v502_v18 }
 0x174   : > { %v696_v22 = vpop.f32.mrf.mxu0 }
 0x175   : > { %556 = vst.msk [vmem:[%s313_s15 + $0x10] sm:$0xff] %vm553_vm1, %v551_v20  ;;  %v549_v24 = vadd.f32 %v532_v11, %v521_v21  ;;  %v524_v25 = vadd.f32 %v696_v22, %v520_v19 }
 0x176   : > { %v505_v27 = vpop.f32.mrf.mxu0 }
 0x177   : > { %554 = vst.msk [vmem:[%s313_s15] sm:$0xff] %vm553_vm1, %v549_v24  ;;  %v552_v28 = vadd.f32 %v547_v26, %v524_v25  ;;  %v522_v29 = vadd.f32 %v518_v23, %v505_v27 }
 0x179   : > { %557 = vst.msk [vmem:[%s313_s15 + $0x18] sm:$0xff] %vm553_vm1, %v552_v28  ;;  %v550_v30 = vadd.f32 %v537_v13, %v522_v29 }
 0x17b   : > { %555 = vst.msk [vmem:[%s313_s15 + $0x8] sm:$0xff] %vm553_vm1, %v550_v30 }
 0x17c PF: > { %s16_s23 = sadd.s32 1, %s748_s23   ;;  %s919_s21 = smov %s744_s22 }
 0x17d   : > { %p13_p5 = scmp.ge.s32.totalorder %s16_s23, 4   ;;  %s920_s22 = smov %s922_s24 }
 0x17f   :  { %15 = sbr.rel (!%p13_p5) target bundleno = 2 (0x2), region = 77 }

// kernel: self_attentional_layer_pallas.7
= control target key start
LH: loop header
LB: loop body
LE: loop exit
PB: predicated region body
PF: predicated region fallthrough
CT: control target
= control target key end

     0   :  { %s2293_s17 = smov 0   ;;  %s2295_s18 = smov 0   ;;  %s2621_s0 = inlined_call_operand.vmem [shape: f32[2,32,16], index: 0, kind: input, shape index: {}]   ;;  %s2622_s1 = inlined_call_operand.vmem [shape: bf16[2,4,8,16], index: 1, kind: input, shape index: {}]   ;;  %s2623_s2 = inlined_call_operand.vmem [shape: bf16[2,4,8,16], index: 2, kind: input, shape index: {}]   ;;  %s2624_s3 = inlined_call_operand.vmem [shape: bf16[4,8,32], index: 3, kind: input, shape index: {}]   ;;  %s2625_s4 = inlined_call_operand.vmem [shape: f32[4,8,1], index: 4, kind: input, shape index: {}]   ;;  %s2626_s5 = inlined_call_operand.vmem [shape: bf16[32,32], index: 5, kind: input, shape index: {}]   ;;  %s2627_s6 = inlined_call_operand.vmem [shape: f32[32,1], index: 6, kind: input, shape index: {}]   ;;  %s2628_s7 = inlined_call_operand.vmem [shape: bf16[64,32], index: 7, kind: input, shape index: {}]   ;;  %s2629_s8 = inlined_call_operand.vmem [shape: bf16[64,32], index: 8, kind: input, shape index: {}]   ;;  %s2630_s9 = inlined_call_operand.vmem [shape: f32[64,1], index: 9, kind: input, shape index: {}]   ;;  %s2631_s10 = inlined_call_operand.vmem [shape: f32[2,64,16], index: 10, kind: output, shape index: {0}]   ;;  %s2632_s11 = inlined_call_operand.vmem [shape: f32[2,1,64,2], index: 11, kind: output, shape index: {1}]  }
   0x1   :  { %s2297_s19 = smov 0  }
   0x2 LB: > { %s34_s20 = sadd.s32 1, %s2224_s18  ;;  %p1917_p0 = scmp.ge.s32.totalorder %s2228_s19, 1  ;;  %s2228_s19 = sphi %s2297_s19, %s22_s19   ;;  %s2224_s18 = sphi %s2295_s18, %s2634_s18   ;;  %s2220_s17 = sphi %s2293_s17, %s2633_s17  }
   0x3   : > { %p36_p1 = scmp.ge.s32.totalorder %s34_s20, 2  ;;  %p381_p2 = scmp.lt.s32.totalorder %s2228_s19, 3 }
   0x5   : > { %s2636_s20 = smov (%p36_p1, %s34_s20), 0  ;;  %p382_p3 = pnand %p1917_p0, %p381_p2 }
   0x6   : > { %p446_p4 = scmp.lt.s32.totalorder (!%p382_p3), %s2220_s17, 1 }
   0x7   : > { %385 = sbr.rel (%p382_p3) target bundleno = 3546 (0xdda), region = 60 }
   0xc   : > { %v2230_v0 = vmov 0.0   ;;  %vm2231_vm0 = vmmov 0   ;;  %v489_v1 = vld [vmem:[%s2625_s4] sm:$0xff]  ;;  %s2638_s17 = smov (!%p446_p4, %s2220_s17), 1  ;;  %v2232_v2 = vmov 0   ;;  %vm495_vm1 = vcmask 261120  }
   0xd   : > { %2023 = vmatprep.subr.bf16.mxu0 %v2230_v0  ;;  %2027 = vmatprep.mubr.msk.bf16.mxu0 %vm2231_vm0, %v2230_v0  ;;  %s1974_s23 = sshll.u32 %s2638_s17, 5  ;;  %v488_v9 = vld [vmem:[%s2624_s3] sm:$0xf]  ;;  %s1975_s29 = sshll.u32 %s2638_s17, 4  ;;  %vm577_vm2 = vcmask 1043456   ;;  %vm573_vm3 = vcmask 64512  }
   0xe   : > { %2162 = vset.pattern.permute.xlu0 %v2232_v2  ;;  %2031 = vmatprep.subr.bf16.mxu1 %v2230_v0  ;;  %s453_s26 = scalar_lea.vmem %s2621_s0, %s1974_s23  ;;  %s2350_s13 = scalar_lea.vmem %s2622_s1, %s1975_s29  ;;  %v1931_v21 = vld [vmem:[%s2624_s3 + $0x4] sm:$0xf]  ;;  %vm622_vm4 = vcmask 130048   ;;  %v1932_v42 = vld [vmem:[%s2625_s4 + $0x8] sm:$0xff]  ;;  %vm1735_vm5 = vcmask 7168   ;;  %vm1744_vm6 = vcmask 15360  }
   0xf   : > { %492 = vperm.xlu0 %2162, %v489_v1   ;;  %2033 = vmatprep.mubr.msk.bf16.mxu1 %vm2231_vm0, %v2230_v0  ;;  %v484_v3 = vld [vmem:[%s453_s26 + $0x10] sm:$0xff]  ;;  %v485_v4 = vld [vmem:[%s453_s26 + $0x18] sm:$0xff]  ;;  %v482_v5 = vld [vmem:[%s453_s26] sm:$0xff]  ;;  %s2377_s24 = scalar_lea.vmem %s2623_s2, %s1975_s29 }
  0x10   : > { %2163 = vset.pattern.permute.xlu1 %v2232_v2  ;;  %v2326_v6 = vpack.c.bf16 %v485_v4, %v484_v3  ;;  %v483_v7 = vld [vmem:[%s453_s26 + $0x8] sm:$0xff]  ;;  %v572_v13 = vld [vmem:[%s2350_s13] sm:$0xf]  ;;  %v1934_v53 = vld [vmem:[%s2350_s13 + $0x4] sm:$0xf] }
  0x11   : > { %v2329_v8 = vpack.c.bf16 %v483_v7, %v482_v5  ;;  %v579_v15 = vsel %vm577_vm2, %v572_v13, 0  ;;  %v645_v54 = vld [vmem:[%s2377_s24] sm:$0xf]  ;;  %v784_v55 = vsel %vm577_vm2, %v1934_v53, 0  ;;  %v1938_v59 = vld [vmem:[%s2624_s3 + $0x8] sm:$0xf] }
  0x12   : > { %2024 = vmatpush3.bf16.msra.mxu0 %v2326_v6  ;;  %2032 = vmatpush3.bf16.msra.mxu1 %v579_v15 }
  0x13   : > { %2025 = vmatprep.subr.bf16.mxu0 %v2230_v0  ;;  %2037 = vmatprep.subr.bf16.mxu1 %v2230_v0 }
  0x16   : > { %2026 = vmatpush3.bf16.msra.mxu0 %v2329_v8 }
  0x17   : > { %2043 = vmatprep.subr.bf16.mxu0 %v2230_v0 }
  0x19   : > { %2028 = vmatmul.mubr.msk.bf16.vlgmr.msra.gmra.mxu0 %vm495_vm1, %v488_v9 }
  0x1a   : > { %2044 = vmatpush3.bf16.msra.mxu0 %v2326_v6  ;;  %2047 = vmatprep.mubr.msk.bf16.mxu0 %vm2231_vm0, %v2230_v0 }
  0x1b   : > { %2045 = vmatprep.subr.bf16.mxu0 %v2230_v0 }
  0x1e   : > { %2046 = vmatpush3.bf16.msra.mxu0 %v2329_v8 }
  0x1f   : > { %2057 = vmatprep.subr.bf16.mxu0 %v2230_v0 }
  0x21   : > { %2048 = vmatmul.mubr.msk.bf16.vlgmr.msra.gmra.mxu0 %vm495_vm1, %v1931_v21 }
  0x22   : > { %2059 = vmatprep.mubr.msk.bf16.mxu0 %vm2231_vm0, %v2230_v0 }
  0x8a   : > { %v493_v10 = vpop.permute.xlu0 %492 }
  0xd9   : > { %v533_v11 = vpop.f32.mrf.mxu0 }
  0xda   : > { %v534_v12 = vadd.f32 %v533_v11, %v493_v10 }
  0xdb   : > { %v2029_v14 = vpop.f32.mrf.mxu0 }
  0xdc   : > { %539 = vxpose.xlu0.b32.start.end [1/1] (short) (narrow) %v534_v12, 16 }
  0xdd   : > { %v536_v16 = vpop.f32.mrf.mxu0 }
  0xdf   : > { %v2030_v17 = vpop.f32.mrf.mxu0 }
  0xe1   : > { %v739_v38 = vpop.f32.mrf.mxu0 }
  0xe3   : > { %v2049_v39 = vpop.f32.mrf.mxu0 }
  0xe5   : > { %v742_v40 = vpop.f32.mrf.mxu0 }
  0xe6   : > { %v1945_v40 = vld [vmem:[%s2624_s3 + $0xc] sm:$0xf] }
  0xe7   : > { %v2050_v41 = vpop.f32.mrf.mxu0 }
 0x158   : > { %v555_v18 = vpop.trf.xlu0 }
 0x15c   : > { %v556_v19 = vpop.trf.xlu0 }
 0x15d   : > { %v571_v20 = vpack.c.bf16 %v556_v19, %v555_v18 }
 0x15f   : > { %2034 = vmatmul.mubr.msk.bf16.vlgmr.msra.gmra.mxu1 %vm573_vm3, %v571_v20 }
 0x160   : > { %2039 = vmatprep.mubr.msk.bf16.mxu1 %vm2231_vm0, %v2230_v0 }
 0x21f   : > { %v615_v22 = vpop.f32.mrf.mxu1 }
 0x220   : > { %v623_v23 = vsel %vm622_vm4, %v615_v22, -inf }
 0x221   : > { %624 = vmax.xlane.f32.xlu1 %v623_v23  ;;  %v2035_v24 = vpop.f32.mrf.mxu1  ;;  %v1939_v23 = vld [vmem:[%s2625_s4 + $0x10] sm:$0xff] }
 0x223   : > { %v618_v25 = vpop.f32.mrf.mxu1 }
 0x224   : > { %v626_v26 = vsel %vm622_vm4, %v618_v25, -inf }
 0x225   : > { %627 = vmax.xlane.f32.xlu1 %v626_v26  ;;  %v2036_v27 = vpop.f32.mrf.mxu1 }
 0x2aa   : > { %v625_v28 = vpop.xlane.xlu1 %624 }
 0x2ab   : > { %v629_v29 = vsub.f32 %v615_v22, %v625_v28 }
 0x2ad   : > { %v631_v30 = vmul.f32 1.442695, %v629_v29 }
 0x2ae   : > { %v628_v31 = vpop.xlane.xlu1 %627 }
 0x2af   : > { %2174 = vpow2.f32 %v631_v30  ;;  %v630_v32 = vsub.f32 %v618_v25, %v628_v31 }
 0x2b1   : > { %v633_v33 = vmul.f32 1.442695, %v630_v32 }
 0x2b3   : > { %2176 = vpow2.f32 %v633_v33 }
 0x2bc   : > { %v2175_v34 = vpop.eup %2174 }
 0x2bd   : > { %v635_v35 = vsel %vm622_vm4, %v2175_v34, 0.0 }
 0x2be   : > { %636 = vadd.xlane.f32.xlu1 %v635_v35  ;;  %v1936_v35 = vld [vmem:[%s2377_s24 + $0x4] sm:$0xf] }
 0x2c0   : > { %v2177_v36 = vpop.eup %2176 }
 0x2c1   : > { %v638_v37 = vsel %vm622_vm4, %v2177_v36, 0.0 }
 0x2c2   : > { %639 = vadd.xlane.f32.xlu1 %v638_v37 }
 0x2d3   : > { %699 = vperm.xlu1 %2163, %v1932_v42  }
 0x347   : > { %v637_v43 = vpop.xlane.xlu1 %636 }
 0x348   : > { %2178 = vrcp.f32 %v637_v43 }
 0x34b   : > { %v640_v44 = vpop.xlane.xlu1 %639 }
 0x34c   : > { %2180 = vrcp.f32 %v640_v44 }
 0x34f   : > { %v700_v45 = vpop.permute.xlu1 %699 }
 0x350   : > { %v740_v46 = vadd.f32 %v739_v38, %v700_v45 }
 0x352   : > { %745 = vxpose.xlu1.b32.start.end [1/1] (short) (narrow) %v740_v46, 16 }
 0x355   : > { %v2179_v47 = vpop.eup %2178 }
 0x356   : > { %v643_v49 = vmul.f32 %v2179_v47, %v2175_v34  ;;  %v1941_v34 = vld [vmem:[%s2350_s13 + $0x8] sm:$0xf] }
 0x359   : > { %v2181_v48 = vpop.eup %2180 }
 0x35a   : > { %v644_v50 = vmul.f32 %v2181_v48, %v2177_v36  ;;  %v989_v36 = vsel %vm577_vm2, %v1941_v34, 0  ;;  %v1619_v34 = vld [vmem:[%s2630_s9 + $0x20] sm:$0xff] }
 0x35c   : > { %v646_v51 = vpack.c.bf16 %v644_v50, %v643_v49 }
 0x35e   : > { %v651_v52 = vsel %vm622_vm4, %v646_v51, 0 }
 0x35f   : > { %2038 = vmatpush3.bf16.xpose.msra.mxu1 %v651_v52 }
 0x360   : > { %2051 = vmatprep.subr.bf16.mxu1 %v2230_v0 }
 0x366   : > { %2040 = vmatmul.mubr.msk.bf16.vlgmr.msra.gmra.mxu1 %vm622_vm4, %v645_v54 }
 0x367   : > { %2052 = vmatpush3.bf16.msra.mxu1 %v784_v55  ;;  %2053 = vmatprep.mubr.msk.bf16.mxu1 %vm2231_vm0, %v2230_v0 }
 0x368   : > { %2063 = vmatprep.subr.bf16.mxu1 %v2230_v0 }
 0x3ce   : > { %v761_v56 = vpop.trf.xlu1 }
 0x3d2   : > { %v762_v57 = vpop.trf.xlu1 }
 0x3d3   : > { %v777_v58 = vpack.c.bf16 %v762_v57, %v761_v56 }
 0x3d5   : > { %2054 = vmatmul.mubr.msk.bf16.vlgmr.msra.gmra.mxu1 %vm573_vm3, %v777_v58 }
 0x3d6   : > { %2064 = vmatpush3.bf16.msra.mxu1 %v2326_v6  ;;  %2067 = vmatprep.mubr.msk.bf16.mxu1 %vm2231_vm0, %v2230_v0 }
 0x3d7   : > { %2065 = vmatprep.subr.bf16.mxu1 %v2230_v0 }
 0x3da   : > { %2066 = vmatpush3.bf16.msra.mxu1 %v2329_v8 }
 0x3db   : > { %2077 = vmatprep.subr.bf16.mxu1 %v2230_v0 }
 0x3dd   : > { %2068 = vmatmul.mubr.msk.bf16.vlgmr.msra.gmra.mxu1 %vm495_vm1, %v1938_v59 }
 0x3de   : > { %2079 = vmatprep.mubr.msk.bf16.mxu1 %vm2231_vm0, %v2230_v0 }
 0x426   : > { %v2400_v60 = vpop.f32.mrf.mxu1 }
 0x428   : > { %v2041_v61 = vpop.f32.mrf.mxu1 }
 0x42a   : > { %v690_v62 = vpop.f32.mrf.mxu1 }
 0x42c   : > { %v2042_v63 = vpop.f32.mrf.mxu1 }
 0x495   : > { %v820_v1 = vpop.f32.mrf.mxu1 }
 0x496   : > { %v827_v2 = vsel %vm622_vm4, %v820_v1, -inf }
 0x497   : > { %828 = vmax.xlane.f32.xlu0 %v827_v2  ;;  %v2055_v3 = vpop.f32.mrf.mxu1 }
 0x498   : > { %v1946_v3 = vld [vmem:[%s2625_s4 + $0x18] sm:$0xff] }
 0x499   : > { %v823_v4 = vpop.f32.mrf.mxu1 }
 0x49a   : > { %v830_v5 = vsel %vm622_vm4, %v823_v4, -inf }
 0x49b   : > { %831 = vmax.xlane.f32.xlu1 %v830_v5  ;;  %v2056_v7 = vpop.f32.mrf.mxu1 }
 0x49d   : > { %v944_v19 = vpop.f32.mrf.mxu1 }
 0x49f   : > { %v2069_v20 = vpop.f32.mrf.mxu1 }
 0x4a1   : > { %v947_v21 = vpop.f32.mrf.mxu1 }
 0x4a3   : > { %v2070_v22 = vpop.f32.mrf.mxu1 }
 0x520   : > { %v829_v9 = vpop.xlane.xlu0 %828 }
 0x521   : > { %v833_v10 = vsub.f32 %v820_v1, %v829_v9 }
 0x523   : > { %v835_v11 = vmul.f32 1.442695, %v833_v10 }
 0x524   : > { %v832_v12 = vpop.xlane.xlu1 %831 }
 0x525   : > { %2182 = vpow2.f32 %v835_v11  ;;  %v834_v13 = vsub.f32 %v823_v4, %v832_v12 }
 0x527   : > { %v837_v14 = vmul.f32 1.442695, %v834_v13 }
 0x529   : > { %2184 = vpow2.f32 %v837_v14 }
 0x532   : > { %v2183_v15 = vpop.eup %2182 }
 0x533   : > { %v839_v16 = vsel %vm622_vm4, %v2183_v15, 0.0 }
 0x534   : > { %840 = vadd.xlane.f32.xlu0 %v839_v16  ;;  %v1948_v16 = vld [vmem:[%s2350_s13 + $0xc] sm:$0xf]  ;;  %s1977_s13 = sshll.u32 %s2638_s17, 6 }
 0x535   : > { %s2547_s21 = scalar_lea.vmem %s2631_s10, %s1977_s13  ;;  %s2586_s25 = scalar_lea.vmem %s2632_s11, %s1977_s13 }
 0x536   : > { %v2185_v17 = vpop.eup %2184 }
 0x537   : > { %v842_v18 = vsel %vm622_vm4, %v2185_v17, 0.0 }
 0x538   : > { %843 = vadd.xlane.f32.xlu0 %v842_v18  ;;  %v1194_v18 = vsel %vm577_vm2, %v1948_v16, 0 }
 0x54e   : > { %904 = vperm.xlu0 %2162, %v1939_v23  }
 0x5bd   : > { %v841_v24 = vpop.xlane.xlu0 %840 }
 0x5be   : > { %2186 = vrcp.f32 %v841_v24 }
 0x5c1   : > { %v844_v25 = vpop.xlane.xlu0 %843 }
 0x5c2   : > { %2188 = vrcp.f32 %v844_v25 }
 0x5c9   : > { %v905_v26 = vpop.permute.xlu0 %904 }
 0x5ca   : > { %v945_v27 = vadd.f32 %v944_v19, %v905_v26 }
 0x5cb   : > { %v2187_v28 = vpop.eup %2186 }
 0x5cc   : > { %950 = vxpose.xlu0.b32.start.end [1/1] (short) (narrow) %v945_v27, 16  ;;  %v847_v30 = vmul.f32 %v2187_v28, %v2183_v15 }
 0x5cf   : > { %v2189_v29 = vpop.eup %2188 }
 0x5d0   : > { %v848_v31 = vmul.f32 %v2189_v29, %v2185_v17  ;;  %v1943_v17 = vld [vmem:[%s2377_s24 + $0x8] sm:$0xf] }
 0x5d2   : > { %v851_v32 = vpack.c.bf16 %v848_v31, %v847_v30  ;;  %v1317_v31 = vld [vmem:[%s2627_s6 + $0x18] sm:$0xff] }
 0x5d4   : > { %v856_v33 = vsel %vm622_vm4, %v851_v32, 0  ;;  %v1615_v32 = vld [vmem:[%s2630_s9] sm:$0xff] }
 0x5d5   : > { %2058 = vmatpush3.bf16.xpose.msra.mxu0 %v856_v33  ;;  %v1617_v33 = vld [vmem:[%s2630_s9 + $0x10] sm:$0xff] }
 0x5d6   : > { %2071 = vmatprep.subr.bf16.mxu0 %v2230_v0 }
 0x5dc   : > { %2060 = vmatmul.mubr.msk.bf16.vlgmr.msra.gmra.mxu0 %vm622_vm4, %v1936_v35  ;;  %v1621_v35 = vld [vmem:[%s2630_s9 + $0x30] sm:$0xff] }
 0x5dd   : > { %2072 = vmatpush3.bf16.msra.mxu0 %v989_v36  ;;  %2073 = vmatprep.mubr.msk.bf16.mxu0 %vm2231_vm0, %v2230_v0 }
 0x5de   : > { %2083 = vmatprep.subr.bf16.mxu0 %v2230_v0 }
 0x648   : > { %v966_v37 = vpop.trf.xlu0 }
 0x64c   : > { %v967_v38 = vpop.trf.xlu0 }
 0x64d   : > { %v982_v39 = vpack.c.bf16 %v967_v38, %v966_v37 }
 0x64f   : > { %2074 = vmatmul.mubr.msk.bf16.vlgmr.msra.gmra.mxu0 %vm573_vm3, %v982_v39 }
 0x650   : > { %2084 = vmatpush3.bf16.msra.mxu0 %v2326_v6  ;;  %2087 = vmatprep.mubr.msk.bf16.mxu0 %vm2231_vm0, %v2230_v0 }
 0x651   : > { %2085 = vmatprep.subr.bf16.mxu0 %v2230_v0 }
 0x654   : > { %2086 = vmatpush3.bf16.msra.mxu0 %v2329_v8 }
 0x655   : > { %2097 = vmatprep.subr.bf16.mxu0 %v2230_v0 }
 0x657   : > { %2088 = vmatmul.mubr.msk.bf16.vlgmr.msra.gmra.mxu0 %vm495_vm1, %v1945_v40 }
 0x658   : > { %2099 = vmatprep.mubr.msk.bf16.mxu0 %vm2231_vm0, %v2230_v0 }
 0x69c   : > { %v2431_v41 = vpop.f32.mrf.mxu0 }
 0x69e   : > { %v2061_v42 = vpop.f32.mrf.mxu0 }
 0x6a0   : > { %v895_v43 = vpop.f32.mrf.mxu0 }
 0x6a2   : > { %v2062_v44 = vpop.f32.mrf.mxu0 }
 0x70f   : > { %v1025_v45 = vpop.f32.mrf.mxu0 }
 0x710   : > { %v1032_v46 = vsel %vm622_vm4, %v1025_v45, -inf }
 0x711   : > { %1033 = vmax.xlane.f32.xlu1 %v1032_v46  ;;  %v2075_v47 = vpop.f32.mrf.mxu0 }
 0x712   : > { %v1316_v47 = vld [vmem:[%s2627_s6 + $0x10] sm:$0xff] }
 0x713   : > { %v1028_v48 = vpop.f32.mrf.mxu0 }
 0x714   : > { %v1035_v49 = vsel %vm622_vm4, %v1028_v48, -inf }
 0x715   : > { %1036 = vmax.xlane.f32.xlu1 %v1035_v49  ;;  %v2076_v50 = vpop.f32.mrf.mxu0  ;;  %v1315_v49 = vld [vmem:[%s2627_s6 + $0x8] sm:$0xff] }
 0x716   : > { %v1616_v50 = vld [vmem:[%s2630_s9 + $0x8] sm:$0xff] }
 0x717   : > { %v1149_v62 = vpop.f32.mrf.mxu0 }
 0x719   : > { %v2089_v63 = vpop.f32.mrf.mxu0 }
 0x71a   : > { %v1950_v63 = vld [vmem:[%s2377_s24 + $0xc] sm:$0xf] }
 0x71b   : > { %v1152_v1 = vpop.f32.mrf.mxu0 }
 0x71c   : > { %v2164_v1 = vld [vmem:[%s2626_s5] sm:$0xff]  }
 0x71d   : > { %v2090_v2 = vpop.f32.mrf.mxu0 }
 0x79a   : > { %v1034_v51 = vpop.xlane.xlu1 %1033 }
 0x79b   : > { %v1038_v52 = vsub.f32 %v1025_v45, %v1034_v51  ;;  %v1618_v51 = vld [vmem:[%s2630_s9 + $0x18] sm:$0xff] }
 0x79d   : > { %v1040_v53 = vmul.f32 1.442695, %v1038_v52  ;;  %v1620_v52 = vld [vmem:[%s2630_s9 + $0x28] sm:$0xff] }
 0x79e   : > { %v1037_v54 = vpop.xlane.xlu1 %1036 }
 0x79f   : > { %2190 = vpow2.f32 %v1040_v53  ;;  %v1039_v55 = vsub.f32 %v1028_v48, %v1037_v54  ;;  %v1314_v48 = vld [vmem:[%s2627_s6] sm:$0xff]  ;;  %v1622_v53 = vld [vmem:[%s2630_s9 + $0x38] sm:$0xff] }
 0x7a1   : > { %v1042_v56 = vmul.f32 1.442695, %v1039_v55 }
 0x7a3   : > { %2192 = vpow2.f32 %v1042_v56 }
 0x7ac   : > { %v2191_v57 = vpop.eup %2190 }
 0x7ad   : > { %v1044_v58 = vsel %vm622_vm4, %v2191_v57, 0.0 }
 0x7ae   : > { %1045 = vadd.xlane.f32.xlu1 %v1044_v58 }
 0x7b0   : > { %v2193_v59 = vpop.eup %2192 }
 0x7b1   : > { %v1047_v61 = vsel %vm622_vm4, %v2193_v59, 0.0 }
 0x7b2   : > { %1048 = vadd.xlane.f32.xlu1 %v1047_v61 }
 0x7c3   : > { %1109 = vperm.xlu1 %2163, %v1946_v3  }
 0x837   : > { %v1046_v4 = vpop.xlane.xlu1 %1045 }
 0x838   : > { %2194 = vrcp.f32 %v1046_v4 }
 0x83b   : > { %v1049_v5 = vpop.xlane.xlu1 %1048 }
 0x83c   : > { %2196 = vrcp.f32 %v1049_v5  ;;  %v1308_v5 = vpack.c.bf16 %v2431_v41, %v2400_v60  ;;  %v2166_v60 = vld [vmem:[%s2628_s7] sm:$0xff]   ;;  %v2167_v41 = vld [vmem:[%s2628_s7 + $0x8] sm:$0xff]  }
 0x83f   : > { %v1110_v7 = vpop.permute.xlu1 %1109 }
 0x840   : > { %v1150_v9 = vadd.f32 %v1149_v62, %v1110_v7 }
 0x842   : > { %1155 = vxpose.xlu0.b32.start.end [1/1] (short) (narrow) %v1150_v9, 16 }
 0x845   : > { %v2195_v10 = vpop.eup %2194 }
 0x846   : > { %v1052_v12 = vmul.f32 %v2195_v10, %v2191_v57  ;;  %v2165_v10 = vld [vmem:[%s2626_s5 + $0x8] sm:$0xff]  }
 0x849   : > { %v2197_v11 = vpop.eup %2196 }
 0x84a   : > { %v1053_v13 = vmul.f32 %v2197_v11, %v2193_v59  ;;  %v2173_v11 = vld [vmem:[%s2628_s7 + $0x18] sm:$0xff]  }
 0x84c   : > { %v1056_v14 = vpack.c.bf16 %v1053_v13, %v1052_v12 }
 0x84e   : > { %v1061_v15 = vsel %vm622_vm4, %v1056_v14, 0 }
 0x84f   : > { %2078 = vmatpush3.bf16.xpose.msra.mxu1 %v1061_v15 }
 0x850   : > { %2091 = vmatprep.subr.bf16.mxu1 %v2230_v0 }
 0x856   : > { %2080 = vmatmul.mubr.msk.bf16.vlgmr.msra.gmra.mxu1 %vm622_vm4, %v1943_v17 }
 0x857   : > { %2092 = vmatpush3.bf16.msra.mxu1 %v1194_v18  ;;  %2093 = vmatprep.mubr.msk.bf16.mxu1 %vm2231_vm0, %v2230_v0 }
 0x8be   : > { %v1171_v19 = vpop.trf.xlu0 }
 0x8c2   : > { %v1172_v20 = vpop.trf.xlu0 }
 0x8c3   : > { %v1187_v21 = vpack.c.bf16 %v1172_v20, %v1171_v19 }
 0x8c5   : > { %2094 = vmatmul.mubr.msk.bf16.vlgmr.msra.gmra.mxu1 %vm573_vm3, %v1187_v21 }
 0x8c6   : > { %2107 = vmatprep.mubr.msk.bf16.mxu1 %vm495_vm1, %v2164_v1 }
 0x916   : > { %v2449_v22 = vpop.f32.mrf.mxu1 }
 0x918   : > { %v2081_v23 = vpop.f32.mrf.mxu1 }
 0x91a   : > { %v1100_v24 = vpop.f32.mrf.mxu1 }
 0x91c   : > { %v2082_v25 = vpop.f32.mrf.mxu1 }
 0x985   : > { %v1230_v26 = vpop.f32.mrf.mxu1 }
 0x986   : > { %v1237_v27 = vsel %vm622_vm4, %v1230_v26, -inf }
 0x987   : > { %1238 = vmax.xlane.f32.xlu0 %v1237_v27  ;;  %v2095_v28 = vpop.f32.mrf.mxu1  ;;  %v2170_v27 = vld [vmem:[%s2629_s8 + $0x10] sm:$0xff]  }
 0x988   : > { %v2172_v28 = vld [vmem:[%s2629_s8 + $0x18] sm:$0xff]  }
 0x989   : > { %v1233_v29 = vpop.f32.mrf.mxu1 }
 0x98a   : > { %v1240_v30 = vsel %vm622_vm4, %v1233_v29, -inf }
 0x98b   : > { %1241 = vmax.xlane.f32.xlu1 %v1240_v30  ;;  %v2096_v0 = vpop.f32.mrf.mxu1 }
 0x99d   : > { %1335 = vperm.xlu0 %2162, %v1317_v31  }
 0x9a1   : > { %1625 = vperm.xlu0 %2162, %v1615_v32  }
 0x9a5   : > { %1635 = vperm.xlu0 %2162, %v1617_v33  }
 0x9a9   : > { %1645 = vperm.xlu0 %2162, %v1619_v34  }
 0x9ad   : > { %1655 = vperm.xlu0 %2162, %v1621_v35  }
 0xa10   : > { %v1239_v36 = vpop.xlane.xlu0 %1238 }
 0xa11   : > { %v1243_v37 = vsub.f32 %v1230_v26, %v1239_v36  ;;  %v2169_v26 = vld [vmem:[%s2629_s8 + $0x8] sm:$0xff]  }
 0xa13   : > { %v1245_v38 = vmul.f32 1.442695, %v1243_v37 }
 0xa14   : > { %v1242_v39 = vpop.xlane.xlu1 %1241 }
 0xa15   : > { %2198 = vpow2.f32 %v1245_v38  ;;  %v1244_v40 = vsub.f32 %v1233_v29, %v1242_v39 }
 0xa17   : > { %v1247_v42 = vmul.f32 1.442695, %v1244_v40 }
 0xa18   : > { %v1336_v16 = vpop.permute.xlu0 %1335 }
 0xa19   : > { %2200 = vpow2.f32 %v1247_v42 }
 0xa1c   : > { %v1626_v0 = vpop.permute.xlu0 %1625 }
 0xa20   : > { %v1636_v33 = vpop.permute.xlu0 %1635 }
 0xa22   : > { %v2199_v43 = vpop.eup %2198 }
 0xa23   : > { %v1249_v44 = vsel %vm622_vm4, %v2199_v43, 0.0 }
 0xa24   : > { %1250 = vadd.xlane.f32.xlu1 %v1249_v44  ;;  %v1646_v40 = vpop.permute.xlu0 %1645 }
 0xa26   : > { %v2201_v45 = vpop.eup %2200 }
 0xa27   : > { %v1252_v46 = vsel %vm622_vm4, %v2201_v45, 0.0 }
 0xa28   : > { %1253 = vadd.xlane.f32.xlu1 %v1252_v46 }
 0xa39   : > { %1330 = vperm.xlu1 %2163, %v1316_v47  }
 0xa3d   : > { %1320 = vperm.xlu1 %2163, %v1314_v48  }
 0xa41   : > { %1325 = vperm.xlu1 %2163, %v1315_v49  }
 0xa45   : > { %1630 = vperm.xlu1 %2163, %v1616_v50  }
 0xa49   : > { %1640 = vperm.xlu1 %2163, %v1618_v51  }
 0xa4d   : > { %1650 = vperm.xlu1 %2163, %v1620_v52  }
 0xa51   : > { %1660 = vperm.xlu1 %2163, %v1622_v53  }
 0xaad   : > { %v1251_v54 = vpop.xlane.xlu1 %1250 }
 0xaae   : > { %2202 = vrcp.f32 %v1251_v54 }
 0xab1   : > { %v1254_v55 = vpop.xlane.xlu1 %1253 }
 0xab2   : > { %2204 = vrcp.f32 %v1254_v55 }
 0xab5   : > { %v1331_v12 = vpop.permute.xlu1 %1330 }
 0xab9   : > { %v1321_v13 = vpop.permute.xlu1 %1320 }
 0xabb   : > { %v2203_v56 = vpop.eup %2202 }
 0xabc   : > { %v1257_v58 = vmul.f32 %v2203_v56, %v2199_v43 }
 0xabd   : > { %v1326_v20 = vpop.permute.xlu1 %1325 }
 0xabf   : > { %v2205_v57 = vpop.eup %2204 }
 0xac0   : > { %v1258_v59 = vmul.f32 %v2205_v57, %v2201_v45 }
 0xac1   : > { %v1631_v32 = vpop.permute.xlu1 %1630 }
 0xac2   : > { %v1261_v61 = vpack.c.bf16 %v1258_v59, %v1257_v58 }
 0xac4   : > { %v1266_v62 = vsel %vm622_vm4, %v1261_v61, 0 }
 0xac5   : > { %2098 = vmatpush3.bf16.xpose.msra.mxu0 %v1266_v62  ;;  %v1641_v37 = vpop.permute.xlu1 %1640  ;;  %v1656_v62 = vpop.permute.xlu0 %1655 }
 0xac9   : > { %v1651_v51 = vpop.permute.xlu1 %1650 }
 0xacc   : > { %2100 = vmatmul.mubr.msk.bf16.vlgmr.msra.gmra.mxu0 %vm622_vm4, %v1950_v63 }
 0xb8c   : > { %v1302_v2 = vpop.f32.mrf.mxu0 }
 0xb8d   : > { %v1309_v3 = vpack.c.bf16 %v1302_v2, %v2449_v22 }
 0xb8e   : > { %v2101_v4 = vpop.f32.mrf.mxu0 }
 0xb8f   : > { %2103 = vmatprep.subr.bf16.mxu1 %v1309_v3 }
 0xb90   : > { %v1305_v7 = vpop.f32.mrf.mxu0  ;;  %2104 = vmatpush3.bf16.msra.mxu1 %v1309_v3 }
 0xb91   : > { %2105 = vmatprep.subr.bf16.mxu1 %v1308_v5 }
 0xb92   : > { %v2102_v9 = vpop.f32.mrf.mxu0 }
 0xb94   : > { %2106 = vmatpush3.bf16.msra.mxu1 %v1308_v5 }
 0xb95   : > { %2123 = vmatprep.subr.bf16.mxu1 %v2326_v6 }
 0xb97   : > { %2108 = vmatmul.mubr.msk.bf16.vlgmr.msra.gmra.mxu1 %vm495_vm1, %v2165_v10 }
 0xb98   : > { %2124 = vmatpush3.bf16.msra.mxu1 %v2326_v6  ;;  %2127 = vmatprep.mubr.msk.bf16.mxu1 %vm495_vm1, %v2166_v60  ;;  %v2168_v6 = vld [vmem:[%s2629_s8] sm:$0xff]  }
 0xb99   : > { %2125 = vmatprep.subr.bf16.mxu1 %v2329_v8  ;;  %2115 = vmatprep.mubr.msk.bf16.mxu0 %vm495_vm1, %v2168_v6 }
 0xb9c   : > { %2126 = vmatpush3.bf16.msra.mxu1 %v2329_v8  ;;  %v2171_v8 = vld [vmem:[%s2628_s7 + $0x10] sm:$0xff]  }
 0xb9f   : > { %2128 = vmatmul.mubr.msk.bf16.vlgmr.msra.gmra.mxu1 %vm495_vm1, %v2167_v41  ;;  %v1661_v41 = vpop.permute.xlu1 %1660 }
 0xba0   : > { %2131 = vmatprep.mubr.msk.bf16.mxu1 %vm495_vm1, %v2171_v8 }
 0xba7   : > { %2132 = vmatmul.mubr.msk.bf16.gmra.mxu1 %vm495_vm1, %v2173_v11 }
 0xc57   : > { %v2109_v14 = vpop.f32.mrf.mxu1 }
 0xc58   : > { %v1397_v18 = vadd.f32 %v2109_v14, %v1331_v12 }
 0xc59   : > { %v1388_v15 = vpop.f32.mrf.mxu1 }
 0xc5a   : > { %v1389_v22 = vadd.f32 %v1388_v15, %v1321_v13 }
 0xc5b   : > { %v2110_v17 = vpop.f32.mrf.mxu1 }
 0xc5c   : > { %v1400_v19 = vadd.f32 %v2110_v17, %v1336_v16 }
 0xc5d   : > { %v1391_v21 = vpop.f32.mrf.mxu1 }
 0xc5e   : > { %v1420_v23 = vpack.c.bf16 %v1400_v19, %v1397_v18  ;;  %v1392_v24 = vadd.f32 %v1391_v21, %v1326_v20 }
 0xc5f   : > { %v2129_v29 = vpop.f32.mrf.mxu1 }
 0xc60   : > { %v1419_v25 = vpack.c.bf16 %v1392_v24, %v1389_v22  ;;  %2111 = vmatprep.subr.bf16.mxu0 %v1420_v23 }
 0xc61   : > { %2112 = vmatpush3.bf16.msra.mxu0 %v1420_v23  ;;  %v1584_v30 = vpop.f32.mrf.mxu1 }
 0xc62   : > { %2113 = vmatprep.subr.bf16.mxu0 %v1419_v25 }
 0xc63   : > { %v2130_v31 = vpop.f32.mrf.mxu1 }
 0xc65   : > { %2114 = vmatpush3.bf16.msra.mxu0 %v1419_v25  ;;  %v1587_v34 = vpop.f32.mrf.mxu1 }
 0xc67   : > { %v2133_v36 = vpop.f32.mrf.mxu1 }
 0xc68   : > { %2116 = vmatmul.mubr.msk.bf16.vlgmr.msra.gmra.mxu0 %vm495_vm1, %v2169_v26 }
 0xc69   : > { %2119 = vmatprep.mubr.msk.bf16.mxu0 %vm495_vm1, %v2170_v27  ;;  %v1600_v45 = vpop.f32.mrf.mxu1 }
 0xc6b   : > { %v2134_v56 = vpop.f32.mrf.mxu1 }
 0xc6d   : > { %v1603_v5 = vpop.f32.mrf.mxu1 }
 0xc70   : > { %2120 = vmatmul.mubr.msk.bf16.gmra.mxu0 %vm495_vm1, %v2172_v28 }
 0xd28   : > { %v2117_v35 = vpop.f32.mrf.mxu0 }
 0xd29   : > { %v1593_v38 = vadd.f32 %v2129_v29, %v2117_v35 }
 0xd2a   : > { %v1487_v39 = vpop.f32.mrf.mxu0 }
 0xd2b   : > { %v1665_v42 = vadd.f32 %v1636_v33, %v1593_v38  ;;  %v1585_v43 = vadd.f32 %v1584_v30, %v1487_v39 }
 0xd2c   : > { %v2118_v44 = vpop.f32.mrf.mxu0 }
 0xd2d   : > { %1673 = vst.msk [vmem:[%s2547_s21 + $0x10] sm:$0xff] %vm622_vm4, %v1665_v42  ;;  %v1663_v46 = vadd.f32 %v1626_v0, %v1585_v43  ;;  %v1596_v47 = vadd.f32 %v2130_v31, %v2118_v44  ;;  %v1685_v48 = vsel %vm622_vm4, %v1665_v42, 0.0  ;;  %v1705_v49 = vmul.f32 %v1665_v42, %v1665_v42 }
 0xd2e   : > { %1686 = vadd.xlane.f32.xlu0 %v1685_v48  ;;  %v1490_v50 = vpop.f32.mrf.mxu0 }
 0xd2f   : > { %1671 = vst.msk [vmem:[%s2547_s21] sm:$0xff] %vm622_vm4, %v1663_v46  ;;  %v1666_v52 = vadd.f32 %v1641_v37, %v1596_v47  ;;  %v1588_v53 = vadd.f32 %v1587_v34, %v1490_v50  ;;  %v1717_v54 = vsel %vm622_vm4, %v1705_v49, 0.0  ;;  %v1703_v57 = vmul.f32 %v1663_v46, %v1663_v46 }
 0xd30   : > { %1718 = vadd.xlane.f32.xlu1 %v1717_v54  ;;  %v2121_v55 = vpop.f32.mrf.mxu0  ;;  %v1679_v61 = vsel %vm622_vm4, %v1663_v46, 0.0 }
 0xd31   : > { %1674 = vst.msk [vmem:[%s2547_s21 + $0x18] sm:$0xff] %vm622_vm4, %v1666_v52  ;;  %v1664_v58 = vadd.f32 %v1631_v32, %v1588_v53  ;;  %v1609_v59 = vadd.f32 %v2133_v36, %v2121_v55  ;;  %v1711_v3 = vsel %vm622_vm4, %v1703_v57, 0.0  ;;  %v1688_v10 = vsel %vm622_vm4, %v1666_v52, 0.0 }
 0xd32   : > { %1680 = vadd.xlane.f32.xlu0 %v1679_v61  ;;  %v1503_v63 = vpop.f32.mrf.mxu0  ;;  %v1706_v60 = vmul.f32 %v1666_v52, %v1666_v52 }
 0xd33   : > { %1672 = vst.msk [vmem:[%s2547_s21 + $0x8] sm:$0xff] %vm622_vm4, %v1664_v58  ;;  %v1669_v1 = vadd.f32 %v1656_v62, %v1609_v59  ;;  %v1601_v2 = vadd.f32 %v1600_v45, %v1503_v63  ;;  %v1682_v12 = vsel %vm622_vm4, %v1664_v58, 0.0  ;;  %v1704_v15 = vmul.f32 %v1664_v58, %v1664_v58 }
 0xd34   : > { %1712 = vadd.xlane.f32.xlu1 %v1711_v3  ;;  %v2122_v4 = vpop.f32.mrf.mxu0  ;;  %v1720_v14 = vsel %vm622_vm4, %v1706_v60, 0.0 }
 0xd35   : > { %1677 = vst.msk [vmem:[%s2547_s21 + $0x30] sm:$0xff] %vm622_vm4, %v1669_v1  ;;  %v1667_v7 = vadd.f32 %v1646_v40, %v1601_v2  ;;  %v1612_v9 = vadd.f32 %v2134_v56, %v2122_v4  ;;  %v1697_v16 = vsel %vm622_vm4, %v1669_v1, 0.0  ;;  %v1714_v17 = vsel %vm622_vm4, %v1704_v15, 0.0 }
 0xd36   : > { %1689 = vadd.xlane.f32.xlu0 %v1688_v10  ;;  %v1506_v6 = vpop.f32.mrf.mxu0  ;;  %v1709_v22 = vmul.f32 %v1669_v1, %v1669_v1 }
 0xd37   : > { %1675 = vst.msk [vmem:[%s2547_s21 + $0x20] sm:$0xff] %vm622_vm4, %v1667_v7  ;;  %v1670_v8 = vadd.f32 %v1661_v41, %v1612_v9  ;;  %v1604_v11 = vadd.f32 %v1603_v5, %v1506_v6  ;;  %v1691_v18 = vsel %vm622_vm4, %v1667_v7, 0.0  ;;  %v1707_v19 = vmul.f32 %v1667_v7, %v1667_v7 }
 0xd38   : > { %1683 = vadd.xlane.f32.xlu1 %v1682_v12  ;;  %v1729_v25 = vsel %vm622_vm4, %v1709_v22, 0.0 }
 0xd39   : > { %1678 = vst.msk [vmem:[%s2547_s21 + $0x38] sm:$0xff] %vm622_vm4, %v1670_v8  ;;  %v1668_v13 = vadd.f32 %v1651_v51, %v1604_v11  ;;  %v1700_v20 = vsel %vm622_vm4, %v1670_v8, 0.0  ;;  %v1723_v21 = vsel %vm622_vm4, %v1707_v19, 0.0  ;;  %v1710_v27 = vmul.f32 %v1670_v8, %v1670_v8 }
 0xd3a   : > { %1721 = vadd.xlane.f32.xlu0 %v1720_v14 }
 0xd3b   : > { %1676 = vst.msk [vmem:[%s2547_s21 + $0x28] sm:$0xff] %vm622_vm4, %v1668_v13  ;;  %v1694_v23 = vsel %vm622_vm4, %v1668_v13, 0.0  ;;  %v1708_v24 = vmul.f32 %v1668_v13, %v1668_v13  ;;  %v1732_v28 = vsel %vm622_vm4, %v1710_v27, 0.0 }
 0xd3c   : > { %1698 = vadd.xlane.f32.xlu1 %v1697_v16 }
 0xd3d   : > { %v1726_v26 = vsel %vm622_vm4, %v1708_v24, 0.0 }
 0xd3e   : > { %1715 = vadd.xlane.f32.xlu0 %v1714_v17 }
 0xd40   : > { %1692 = vadd.xlane.f32.xlu1 %v1691_v18 }
 0xd42   : > { %1701 = vadd.xlane.f32.xlu0 %v1700_v20 }
 0xd44   : > { %1724 = vadd.xlane.f32.xlu1 %v1723_v21 }
 0xd46   : > { %1695 = vadd.xlane.f32.xlu0 %v1694_v23 }
 0xd48   : > { %1730 = vadd.xlane.f32.xlu1 %v1729_v25 }
 0xd4a   : > { %1727 = vadd.xlane.f32.xlu0 %v1726_v26 }
 0xd4e   : > { %1733 = vadd.xlane.f32.xlu0 %v1732_v28 }
 0xdb7   : > { %v1687_v29 = vpop.xlane.xlu0 %1686 }
 0xdb9   : > { %v1719_v30 = vpop.xlane.xlu1 %1718 }
 0xdba   : > { %v1738_v0 = vsel %vm1735_vm5, %v1687_v29, %v1719_v30 }
 0xdbb   : > { %1747 = vst.msk [vmem:[%s2586_s25 + $0x10] sm:$0xff] %vm1744_vm6, %v1738_v0  ;;  %v1681_v31 = vpop.xlane.xlu0 %1680 }
 0xdbd   : > { %v1713_v32 = vpop.xlane.xlu1 %1712 }
 0xdbe   : > { %v1736_v33 = vsel %vm1735_vm5, %v1681_v31, %v1713_v32 }
 0xdbf   : > { %1745 = vst.msk [vmem:[%s2586_s25] sm:$0xff] %vm1744_vm6, %v1736_v33  ;;  %v1690_v34 = vpop.xlane.xlu0 %1689 }
 0xdc1   : > { %v1684_v35 = vpop.xlane.xlu1 %1683 }
 0xdc3   : > { %v1722_v36 = vpop.xlane.xlu0 %1721 }
 0xdc4   : > { %v1739_v37 = vsel %vm1735_vm5, %v1690_v34, %v1722_v36 }
 0xdc5   : > { %1748 = vst.msk [vmem:[%s2586_s25 + $0x18] sm:$0xff] %vm1744_vm6, %v1739_v37  ;;  %v1699_v38 = vpop.xlane.xlu1 %1698 }
 0xdc7   : > { %v1716_v39 = vpop.xlane.xlu0 %1715 }
 0xdc8   : > { %v1737_v40 = vsel %vm1735_vm5, %v1684_v35, %v1716_v39 }
 0xdc9   : > { %1746 = vst.msk [vmem:[%s2586_s25 + $0x8] sm:$0xff] %vm1744_vm6, %v1737_v40  ;;  %v1693_v42 = vpop.xlane.xlu1 %1692 }
 0xdcb   : > { %v1702_v43 = vpop.xlane.xlu0 %1701 }
 0xdcd   : > { %v1725_v44 = vpop.xlane.xlu1 %1724 }
 0xdce   : > { %v1740_v45 = vsel %vm1735_vm5, %v1693_v42, %v1725_v44 }
 0xdcf   : > { %1749 = vst.msk [vmem:[%s2586_s25 + $0x20] sm:$0xff] %vm1744_vm6, %v1740_v45  ;;  %v1696_v46 = vpop.xlane.xlu0 %1695 }
 0xdd1   : > { %v1731_v47 = vpop.xlane.xlu1 %1730 }
 0xdd2   : > { %v1742_v48 = vsel %vm1735_vm5, %v1699_v38, %v1731_v47 }
 0xdd3   : > { %1751 = vst.msk [vmem:[%s2586_s25 + $0x30] sm:$0xff] %vm1744_vm6, %v1742_v48  ;;  %v1728_v49 = vpop.xlane.xlu0 %1727 }
 0xdd4   : > { %v1741_v50 = vsel %vm1735_vm5, %v1696_v46, %v1728_v49 }
 0xdd5   : > { %1750 = vst.msk [vmem:[%s2586_s25 + $0x28] sm:$0xff] %vm1744_vm6, %v1741_v50 }
 0xdd7   : > { %v1734_v51 = vpop.xlane.xlu0 %1733 }
 0xdd8   : > { %v1743_v52 = vsel %vm1735_vm5, %v1702_v43, %v1734_v51 }
 0xdd9   : > { %1752 = vst.msk [vmem:[%s2586_s25 + $0x38] sm:$0xff] %vm1744_vm6, %v1743_v52 }
 0xdda PF: > { %s22_s19 = sadd.s32 1, %s2228_s19   ;;  %s2633_s17 = smov %s2224_s18 }
 0xddb   : > { %p19_p5 = scmp.ge.s32.totalorder %s22_s19, 4   ;;  %s2634_s18 = smov %s2636_s20 }
 0xddd   :  { %21 = sbr.rel (!%p19_p5) target bundleno = 2 (0x2), region = 120 }

</bundles_post_ra>
